<compile_context>
chip_gen: v7x
topology: tpu7x:2x2x1
jax: 0.10.0
libtpu: 0.0.40
codegen_flags: <defaults>
</compile_context>

<pallas_src>
import jax
import jax.numpy as jnp
from jax import lax
from jax.experimental import pallas as pl
from jax.experimental.pallas import tpu as pltpu

LANE = 128  # every packed matrix's output dim fits inside one 128-lane tile


# ---------------------------------------------------------------------------
# helpers
# ---------------------------------------------------------------------------
def _round_up(n, m):
    return ((n + m - 1) // m) * m


def _full_spec(a):
    shape = tuple(a.shape)
    n = len(shape)
    return pl.BlockSpec(shape, lambda i, _n=n: (0,) * _n)


def _reorder_gates_ifgo_to_ifog(m, H):
    """PyTorch LSTM gate order along the 4H axis is (i, f, g, o); repack to (i, f, o, g)
    so the kernel can run ONE sigmoid over [:, :3H] and ONE tanh over [:, 3H:]."""
    return jnp.concatenate([m[..., :2 * H], m[..., 3 * H:4 * H], m[..., 2 * H:3 * H]], axis=-1)


# ---------------------------------------------------------------------------
# Parameter packing: two slabs (bf16 weights, f32 biases) + static config
# ---------------------------------------------------------------------------
def pack_params(p, use_maxpool, time_steps):
    w_blocks, w_offs = [], {}
    b_rows, b_offs = [], {}

    def add_w(name, mat):
        r, c = mat.shape
        assert c <= LANE
        rp = _round_up(r, 8)
        blk = jnp.zeros((rp, LANE), jnp.float32).at[:r, :c].set(mat)
        w_offs[name] = sum(b.shape[0] for b in w_blocks)
        w_blocks.append(blk)

    def add_b(name, vec):
        c = vec.shape[-1]
        b_offs[name] = len(b_rows)
        b_rows.append(jnp.zeros((1, LANE), jnp.float32).at[:, :c].set(vec.reshape(1, c)))

    cfg = {"convs": [], "lstms": []}

    # ---- conv stack (im2col-free: one (Cin, Cout) block per tap) ----
    T = time_steps
    for li, (w, b) in enumerate(p["convs"]):
        K, Cin, Cout = w.shape
        assert K % 2 == 1, "only odd kernel_size reproduces PyTorch 'same'-length conv here"
        taps = []
        for k in range(K):
            name = f"conv{li}_k{k}"
            add_w(name, w[k])
            taps.append(name)
        add_b(f"conv{li}_b", b)
        pool = bool(use_maxpool and T >= 4)        # mirrors nn.MaxPool1d placement in __init__
        cfg["convs"].append(dict(T=T, K=K, Cin=Cin, Cout=Cout, taps=taps,
                                 bias=f"conv{li}_b", pool=pool))
        if pool:
            T //= 2

    # ---- LSTM stack (gate columns reordered to i, f, o, g) ----
    for li, (wih, whh, bb) in enumerate(p["lstms"]):
        In, H4 = wih.shape
        H = H4 // 4
        add_w(f"lstm{li}_wih", _reorder_gates_ifgo_to_ifog(wih, H))
        add_w(f"lstm{li}_whh", _reorder_gates_ifgo_to_ifog(whh, H))
        add_b(f"lstm{li}_b", _reorder_gates_ifgo_to_ifog(bb, H))
        cfg["lstms"].append(dict(In=In, H=H, wih=f"lstm{li}_wih",
                                 whh=f"lstm{li}_whh", bias=f"lstm{li}_b"))
    cfg["lstm_T"] = T

    # ---- MLP head ----
    add_w("fc1_w", p["w1"]); add_b("fc1_b", p["b1"])
    add_w("fc2_w", p["w2"]); add_b("fc2_b", p["b2"])
    cfg["dense"] = p["w1"].shape[1]
    cfg["out"] = p["w2"].shape[1]

    w_slab = jnp.concatenate(w_blocks, axis=0).astype(jnp.bfloat16)
    nb = _round_up(len(b_rows), 8)
    b_rows += [jnp.zeros((1, LANE), jnp.float32)] * (nb - len(b_rows))
    b_slab = jnp.concatenate(b_rows, axis=0)

    cfg["w_offs"], cfg["b_offs"] = w_offs, b_offs
    return w_slab, b_slab, cfg


# ---------------------------------------------------------------------------
# Fully fused forward kernel: conv stack -> LSTM stack -> MLP head
# ---------------------------------------------------------------------------
def build_fused_kernel(B, cfg):
    f32, bf16 = jnp.float32, jnp.bfloat16
    w_offs, b_offs = cfg["w_offs"], cfg["b_offs"]
    num_lstm = len(cfg["lstms"])

    def kernel(x_ref, w_ref, b_ref, o_ref):
        # -------------------- conv -> ReLU -> maxpool stack --------------------------
        # Activations stay in flattened (B*T, C) form (row = b*T + t, batch-major).
        h = x_ref[...]                                      # (B*T0, Cin0) f32
        for lc in cfg["convs"]:
            T, K, Cin, Cout, pool = lc["T"], lc["K"], lc["Cin"], lc["Cout"], lc["pool"]
            pad = K // 2
            M = B * T
            hb = h.astype(bf16)

            # row index -> time index within its sequence (for boundary masking)
            r_idx = lax.broadcasted_iota(jnp.int32, (M, Cout), 0)
            if (T & (T - 1)) == 0:                          # power-of-two T: cheap bit-and
                t_idx = r_idx & (T - 1)
            else:
                t_idx = lax.broadcasted_iota(jnp.int32, (B, T, Cout), 1).reshape(M, Cout)

            # 'same' conv: out[t] = sum_k h[t + k - pad] @ w[k] (out-of-range rows are 0).
            # K accumulated dots; shifts via pltpu.roll (XLU) + where mask (VPU).
            y = None
            for k in range(K):
                off = w_offs[lc["taps"][k]]
                a = jnp.dot(hb, w_ref[off:off + Cin, :Cout], preferred_element_type=f32)
                s = pad - k                                  # >0: pull from earlier timesteps
                if s == 0:
                    contrib = a
                else:
                    rolled = pltpu.roll(a, shift=s % M, axis=0)
                    ok = (t_idx >= s) if s > 0 else (t_idx <= T - 1 + s)
                    contrib = jnp.where(ok, rolled, 0.0)
                y = contrib if y is None else y + contrib

            brow = b_offs[lc["bias"]]
            y = jnp.maximum(y + b_ref[brow:brow + 1, :Cout], 0.0)   # bias + ReLU, f32 VPU

            if pool:                                        # MaxPool1d(2), floor semantics
                if T % 2 == 0:
                    y = jnp.max(y.reshape(M // 2, 2, Cout), axis=1)
                else:
                    Tp = 2 * (T // 2)
                    y = jnp.max(y.reshape(B, T, Cout)[:, :Tp, :]
                                 .reshape(B * (Tp // 2), 2, Cout), axis=1)
            h = y
        # dropout1: identity at inference

        # ------------------------------ LSTM stack ------------------------------------
        T = cfg["lstm_T"]
        h_last = None
        for li, lp in enumerate(cfg["lstms"]):
            In, H = lp["In"], lp["H"]
            wih = w_ref[w_offs[lp["wih"]]: w_offs[lp["wih"]] + In, :4 * H]   # bf16 slab
            whh = w_ref[w_offs[lp["whh"]]: w_offs[lp["whh"]] + H, :4 * H]
            brow = b_offs[lp["bias"]]
            bias = b_ref[brow:brow + 1, :4 * H]                              # f32 (b_ih + b_hh)

            # Hoisted input projection: one (B*T, 4H) matmul outside the recurrence.
            xproj = jnp.dot(h.astype(bf16), wih, preferred_element_type=f32) + bias
            xproj = xproj.reshape(B, T, 4 * H)

            h_t = jnp.zeros((B, H), f32)
            c_t = jnp.zeros((B, H), f32)
            last = (li == num_lstm - 1)
            outs = []
            # T is tiny after pooling (2 here) -> static unroll keeps the serial
            # recurrence fully visible to the scheduler; no per-step masked stores.
            for t in range(T):
                gates = xproj[:, t, :] + jnp.dot(h_t.astype(bf16), whh,
                                                 preferred_element_type=f32)
                # gate order (i, f, o, g): one sigmoid stream + one tanh stream
                ifo = jax.nn.sigmoid(gates[:, :3 * H])
                g_g = jnp.tanh(gates[:, 3 * H:])
                c_t = ifo[:, H:2 * H] * c_t + ifo[:, :H] * g_g
                h_t = ifo[:, 2 * H:3 * H] * jnp.tanh(c_t)
                if not last:
                    outs.append(h_t)
            if last:
                h_last = h_t                                 # head only needs the final step
            else:
                h = jnp.stack(outs, axis=1).reshape(B * T, H)
        # dropout2: identity at inference

        # ------------------------------- MLP head --------------------------------------
        D, O = cfg["dense"], cfg["out"]
        Hl = cfg["lstms"][-1]["H"]
        w1 = w_ref[w_offs["fc1_w"]: w_offs["fc1_w"] + Hl, :D]
        b1 = b_ref[b_offs["fc1_b"]: b_offs["fc1_b"] + 1, :D]
        w2 = w_ref[w_offs["fc2_w"]: w_offs["fc2_w"] + D, :O]
        b2 = b_ref[b_offs["fc2_b"]: b_offs["fc2_b"] + 1, :O]
        z = jnp.maximum(jnp.dot(h_last.astype(bf16), w1, preferred_element_type=f32) + b1, 0.0)
        out = jnp.dot(z.astype(bf16), w2, preferred_element_type=f32) + b2
        o_ref[...] = out.astype(o_ref.dtype)

    return kernel


def cnn_lstm_forward(x, p, use_maxpool=True):
    B, T0, F = x.shape
    w_slab, b_slab, cfg = pack_params(p, use_maxpool, T0)
    O = cfg["out"]
    kernel = build_fused_kernel(B, cfg)
    x_flat = x.reshape(B * T0, F)                  # free metadata reshape outside the kernel
    return pl.pallas_call(
        kernel,
        grid=(1,),
        in_specs=[_full_spec(x_flat), _full_spec(w_slab), _full_spec(b_slab)],
        out_specs=pl.BlockSpec((B, O), lambda i: (0, 0)),
        out_shape=jax.ShapeDtypeStruct((B, O), jnp.float32),
        compiler_params=pltpu.CompilerParams(dimension_semantics=("arbitrary",)),
    )(x_flat, w_slab, b_slab)


# ---------------------------------------------------------------------------
# Pure-JAX f32 reference (same math, PyTorch gate order) for a sanity check
# ---------------------------------------------------------------------------
def reference_forward(x, p, use_maxpool=True):
    h = x
    for (w, b) in p["convs"]:
        B, T, _ = h.shape
        K, _, Cout = w.shape
        pad = K // 2
        xp = jnp.pad(h, ((0, 0), (pad, pad), (0, 0)))
        Tout = T + 2 * pad - (K - 1)
        y = jnp.zeros((B, Tout, Cout), jnp.float32)
        for k in range(K):
            y = y + jnp.einsum("btc,cd->btd", xp[:, k:k + Tout, :], w[k])
        y = jax.nn.relu(y + b)
        if use_maxpool and T >= 4:
            Tp = 2 * (Tout // 2)
            y = jnp.max(y[:, :Tp, :].reshape(B, Tp // 2, 2, Cout), axis=2)
        h = y
    for (wih, whh, bb) in p["lstms"]:
        B, T, _ = h.shape
        H = whh.shape[0]
        ht = jnp.zeros((B, H), jnp.float32)
        ct = jnp.zeros((B, H), jnp.float32)
        outs = []
        for t in range(T):
            gates = h[:, t, :] @ wih + ht @ whh + bb
            i_g = jax.nn.sigmoid(gates[:, 0:H])
            f_g = jax.nn.sigmoid(gates[:, H:2 * H])
            g_g = jnp.tanh(gates[:, 2 * H:3 * H])
            o_g = jax.nn.sigmoid(gates[:, 3 * H:4 * H])
            ct = f_g * ct + i_g * g_g
            ht = o_g * jnp.tanh(ct)
            outs.append(ht)
        h = jnp.stack(outs, axis=1)
    last = h[:, -1, :]
    z = jax.nn.relu(last @ p["w1"] + p["b1"])
    return z @ p["w2"] + p["b2"]


# ---------------------------------------------------------------------------
# Deterministic parameter init (shapes mirror the PyTorch module, pre-transposed)
# ---------------------------------------------------------------------------
def init_params(key, num_features, conv_channels, kernel_size,
                lstm_hidden, lstm_layers, dense_size, output_size):
    keys = iter(jax.random.split(key, 64))
    p = {"convs": [], "lstms": []}

    cin = num_features
    for cout in conv_channels:
        w = 0.2 * jax.random.normal(next(keys), (kernel_size, cin, cout), jnp.float32)
        b = 0.1 * jax.random.normal(next(keys), (1, cout), jnp.float32)
        p["convs"].append((w, b))
        cin = cout

    in_size = cin
    for _ in range(lstm_layers):
        wih = 0.2 * jax.random.normal(next(keys), (in_size, 4 * lstm_hidden), jnp.float32)
        whh = 0.2 * jax.random.normal(next(keys), (lstm_hidden, 4 * lstm_hidden), jnp.float32)
        bb = 0.1 * jax.random.normal(next(keys), (1, 4 * lstm_hidden), jnp.float32)
        p["lstms"].append((wih, whh, bb))
        in_size = lstm_hidden

    p["w1"] = 0.2 * jax.random.normal(next(keys), (lstm_hidden, dense_size), jnp.float32)
    p["b1"] = 0.1 * jax.random.normal(next(keys), (1, dense_size), jnp.float32)
    p["w2"] = 0.2 * jax.random.normal(next(keys), (dense_size, output_size), jnp.float32)
    p["b2"] = 0.1 * jax.random.normal(next(keys), (1, output_size), jnp.float32)
    return p


if __name__ == "__main__":
    # input_shape = (time_steps=16, num_features=4), batch=2
    B, T, F = 2, 16, 4
    conv_channels = [48, 32, 16]
    kernel_size = 3
    lstm_hidden = 20
    lstm_layers = 3
    dense_size = 20
    output_size = 1

    key = jax.random.PRNGKey(0)
    k_param, k_x = jax.random.split(key)
    params = init_params(k_param, F, conv_channels, kernel_size,
                         lstm_hidden, lstm_layers, dense_size, output_size)
    x = jax.random.normal(k_x, (B, T, F), jnp.float32)

    y = cnn_lstm_forward(x, params)
    y = jax.block_until_ready(y)
    assert y.shape == (B, output_size), y.shape

    y_ref = reference_forward(x, params)
    # Tolerance accounts for bf16 MXU operands (f32 accumulation / f32 elementwise).
    assert jnp.allclose(y, y_ref, atol=3e-2, rtol=3e-2), (
        f"mismatch: max abs diff = {float(jnp.max(jnp.abs(y - y_ref)))}"
    )

    print("KERNEL_OK")
</pallas_src>

<mosaic_0001>
module attributes {stable_mosaic.version = 11 : i64} {
  func.func @kernel(%arg0: i32, %arg1: memref<32x4xf32, #tpu.memory_space<vmem>>, %arg2: memref<448x128xbf16, #tpu.memory_space<vmem>>, %arg3: memref<8x128xf32, #tpu.memory_space<vmem>>, %arg4: memref<2x1xf32, #tpu.memory_space<vmem>>) attributes {dimension_semantics = [#tpu.dimension_semantics<arbitrary>], iteration_bounds = array<i64: 1>, scalar_prefetch = 0 : i64, scratch_operands = 0 : i64, tpu.core_type = #tpu.core_type<tc>, window_params = [{pipeline_mode = #tpu.pipeline_mode<synchronous>, transform_indices = @transform_0, window_bounds = array<i64: 32, 4>}, {pipeline_mode = #tpu.pipeline_mode<synchronous>, transform_indices = @transform_1, window_bounds = array<i64: 448, 128>}, {pipeline_mode = #tpu.pipeline_mode<synchronous>, transform_indices = @transform_2, window_bounds = array<i64: 8, 128>}, {pipeline_mode = #tpu.pipeline_mode<synchronous>, transform_indices = @transform_3, window_bounds = array<i64: 2, 1>}]} {
    %c0 = arith.constant 0 : index
    %c0_0 = arith.constant 0 : index
    %0 = vector.load %arg1[%c0, %c0_0] : memref<32x4xf32, #tpu.memory_space<vmem>>, vector<32x4xf32>
    %1 = arith.truncf %0 : vector<32x4xf32> to vector<32x4xbf16>
    %2 = tpu.iota {dimensions = array<i32: 0>} : vector<32x48xi32>
    %c15_i32 = arith.constant 15 : i32
    %3 = vector.broadcast %c15_i32 : i32 to vector<32x48xi32>
    %4 = arith.andi %2, %3 : vector<32x48xi32>
    %c0_1 = arith.constant 0 : index
    %c0_2 = arith.constant 0 : index
    %5 = vector.load %arg2[%c0_1, %c0_2] : memref<448x128xbf16, #tpu.memory_space<vmem>>, vector<4x48xbf16>
    %cst = arith.constant dense<0.000000e+00> : vector<32x48xf32>
    %6 = tpu.matmul %1, %5, %cst {dimension_numbers = #tpu.dot_dimension_numbers<[1], [0], [0], [1], [0, 0, 1, 1], [], []>} : vector<32x4xbf16>, vector<4x48xbf16>, vector<32x48xf32> -> vector<32x48xf32>
    %c1_i32 = arith.constant 1 : i32
    %7 = tpu.dynamic_rotate %6 by %c1_i32 dim 0 : vector<32x48xf32>, i32 -> vector<32x48xf32>
    %c1_i32_3 = arith.constant 1 : i32
    %8 = vector.broadcast %c1_i32_3 : i32 to vector<32x48xi32>
    %9 = arith.cmpi sge, %4, %8 : vector<32x48xi32>
    %cst_4 = arith.constant 0.000000e+00 : f32
    %10 = vector.broadcast %cst_4 : f32 to vector<32x48xf32>
    %11 = arith.select %9, %7, %10 : vector<32x48xi1>, vector<32x48xf32>
    %c8 = arith.constant 8 : index
    %c0_5 = arith.constant 0 : index
    %12 = vector.load %arg2[%c8, %c0_5] : memref<448x128xbf16, #tpu.memory_space<vmem>>, vector<4x48xbf16>
    %cst_6 = arith.constant dense<0.000000e+00> : vector<32x48xf32>
    %13 = tpu.matmul %1, %12, %cst_6 {dimension_numbers = #tpu.dot_dimension_numbers<[1], [0], [0], [1], [0, 0, 1, 1], [], []>} : vector<32x4xbf16>, vector<4x48xbf16>, vector<32x48xf32> -> vector<32x48xf32>
    %14 = arith.addf %11, %13 : vector<32x48xf32>
    %c16 = arith.constant 16 : index
    %c0_7 = arith.constant 0 : index
    %15 = vector.load %arg2[%c16, %c0_7] : memref<448x128xbf16, #tpu.memory_space<vmem>>, vector<4x48xbf16>
    %cst_8 = arith.constant dense<0.000000e+00> : vector<32x48xf32>
    %16 = tpu.matmul %1, %15, %cst_8 {dimension_numbers = #tpu.dot_dimension_numbers<[1], [0], [0], [1], [0, 0, 1, 1], [], []>} : vector<32x4xbf16>, vector<4x48xbf16>, vector<32x48xf32> -> vector<32x48xf32>
    %c31_i32 = arith.constant 31 : i32
    %17 = tpu.dynamic_rotate %16 by %c31_i32 dim 0 : vector<32x48xf32>, i32 -> vector<32x48xf32>
    %c14_i32 = arith.constant 14 : i32
    %18 = vector.broadcast %c14_i32 : i32 to vector<32x48xi32>
    %19 = arith.cmpi sle, %4, %18 : vector<32x48xi32>
    %cst_9 = arith.constant 0.000000e+00 : f32
    %20 = vector.broadcast %cst_9 : f32 to vector<32x48xf32>
    %21 = arith.select %19, %17, %20 : vector<32x48xi1>, vector<32x48xf32>
    %22 = arith.addf %14, %21 : vector<32x48xf32>
    %c0_10 = arith.constant 0 : index
    %c0_11 = arith.constant 0 : index
    %23 = vector.load %arg3[%c0_10, %c0_11] : memref<8x128xf32, #tpu.memory_space<vmem>>, vector<1x48xf32>
    %24 = vector.broadcast %23 : vector<1x48xf32> to vector<32x48xf32>
    %25 = arith.addf %22, %24 : vector<32x48xf32>
    %cst_12 = arith.constant 0.000000e+00 : f32
    %26 = vector.broadcast %cst_12 : f32 to vector<32x48xf32>
    %27 = arith.maximumf %25, %26 : vector<32x48xf32>
    %28 = vector.shape_cast %27 : vector<32x48xf32> to vector<16x2x48xf32>
    %cst_13 = arith.constant dense<0xFF800000> : vector<16x48xf32>
    %29 = vector.multi_reduction <maximumf>, %28, %cst_13 [1] : vector<16x2x48xf32> to vector<16x48xf32>
    %30 = arith.truncf %29 : vector<16x48xf32> to vector<16x48xbf16>
    %31 = tpu.iota {dimensions = array<i32: 0>} : vector<16x32xi32>
    %c7_i32 = arith.constant 7 : i32
    %32 = vector.broadcast %c7_i32 : i32 to vector<16x32xi32>
    %33 = arith.andi %31, %32 : vector<16x32xi32>
    %c24 = arith.constant 24 : index
    %c0_14 = arith.constant 0 : index
    %34 = vector.load %arg2[%c24, %c0_14] : memref<448x128xbf16, #tpu.memory_space<vmem>>, vector<48x32xbf16>
    %cst_15 = arith.constant dense<0.000000e+00> : vector<16x32xf32>
    %35 = tpu.matmul %30, %34, %cst_15 {dimension_numbers = #tpu.dot_dimension_numbers<[1], [0], [0], [1], [0, 0, 1, 1], [], []>} : vector<16x48xbf16>, vector<48x32xbf16>, vector<16x32xf32> -> vector<16x32xf32>
    %c1_i32_16 = arith.constant 1 : i32
    %36 = tpu.dynamic_rotate %35 by %c1_i32_16 dim 0 : vector<16x32xf32>, i32 -> vector<16x32xf32>
    %c1_i32_17 = arith.constant 1 : i32
    %37 = vector.broadcast %c1_i32_17 : i32 to vector<16x32xi32>
    %38 = arith.cmpi sge, %33, %37 : vector<16x32xi32>
    %cst_18 = arith.constant 0.000000e+00 : f32
    %39 = vector.broadcast %cst_18 : f32 to vector<16x32xf32>
    %40 = arith.select %38, %36, %39 : vector<16x32xi1>, vector<16x32xf32>
    %c72 = arith.constant 72 : index
    %c0_19 = arith.constant 0 : index
    %41 = vector.load %arg2[%c72, %c0_19] : memref<448x128xbf16, #tpu.memory_space<vmem>>, vector<48x32xbf16>
    %cst_20 = arith.constant dense<0.000000e+00> : vector<16x32xf32>
    %42 = tpu.matmul %30, %41, %cst_20 {dimension_numbers = #tpu.dot_dimension_numbers<[1], [0], [0], [1], [0, 0, 1, 1], [], []>} : vector<16x48xbf16>, vector<48x32xbf16>, vector<16x32xf32> -> vector<16x32xf32>
    %43 = arith.addf %40, %42 : vector<16x32xf32>
    %c120 = arith.constant 120 : index
    %c0_21 = arith.constant 0 : index
    %44 = vector.load %arg2[%c120, %c0_21] : memref<448x128xbf16, #tpu.memory_space<vmem>>, vector<48x32xbf16>
    %cst_22 = arith.constant dense<0.000000e+00> : vector<16x32xf32>
    %45 = tpu.matmul %30, %44, %cst_22 {dimension_numbers = #tpu.dot_dimension_numbers<[1], [0], [0], [1], [0, 0, 1, 1], [], []>} : vector<16x48xbf16>, vector<48x32xbf16>, vector<16x32xf32> -> vector<16x32xf32>
    %c15_i32_23 = arith.constant 15 : i32
    %46 = tpu.dynamic_rotate %45 by %c15_i32_23 dim 0 : vector<16x32xf32>, i32 -> vector<16x32xf32>
    %c6_i32 = arith.constant 6 : i32
    %47 = vector.broadcast %c6_i32 : i32 to vector<16x32xi32>
    %48 = arith.cmpi sle, %33, %47 : vector<16x32xi32>
    %cst_24 = arith.constant 0.000000e+00 : f32
    %49 = vector.broadcast %cst_24 : f32 to vector<16x32xf32>
    %50 = arith.select %48, %46, %49 : vector<16x32xi1>, vector<16x32xf32>
    %51 = arith.addf %43, %50 : vector<16x32xf32>
    %c1 = arith.constant 1 : index
    %c0_25 = arith.constant 0 : index
    %52 = vector.load %arg3[%c1, %c0_25] : memref<8x128xf32, #tpu.memory_space<vmem>>, vector<1x32xf32>
    %53 = vector.broadcast %52 : vector<1x32xf32> to vector<16x32xf32>
    %54 = arith.addf %51, %53 : vector<16x32xf32>
    %cst_26 = arith.constant 0.000000e+00 : f32
    %55 = vector.broadcast %cst_26 : f32 to vector<16x32xf32>
    %56 = arith.maximumf %54, %55 : vector<16x32xf32>
    %57 = vector.shape_cast %56 : vector<16x32xf32> to vector<8x2x32xf32>
    %cst_27 = arith.constant dense<0xFF800000> : vector<8x32xf32>
    %58 = vector.multi_reduction <maximumf>, %57, %cst_27 [1] : vector<8x2x32xf32> to vector<8x32xf32>
    %59 = arith.truncf %58 : vector<8x32xf32> to vector<8x32xbf16>
    %60 = tpu.iota {dimensions = array<i32: 0>} : vector<8x16xi32>
    %c3_i32 = arith.constant 3 : i32
    %61 = vector.broadcast %c3_i32 : i32 to vector<8x16xi32>
    %62 = arith.andi %60, %61 : vector<8x16xi32>
    %c168 = arith.constant 168 : index
    %c0_28 = arith.constant 0 : index
    %63 = vector.load %arg2[%c168, %c0_28] : memref<448x128xbf16, #tpu.memory_space<vmem>>, vector<32x16xbf16>
    %cst_29 = arith.constant dense<0.000000e+00> : vector<8x16xf32>
    %64 = tpu.matmul %59, %63, %cst_29 {dimension_numbers = #tpu.dot_dimension_numbers<[1], [0], [0], [1], [0, 0, 1, 1], [], []>} : vector<8x32xbf16>, vector<32x16xbf16>, vector<8x16xf32> -> vector<8x16xf32>
    %c1_i32_30 = arith.constant 1 : i32
    %65 = tpu.dynamic_rotate %64 by %c1_i32_30 dim 0 : vector<8x16xf32>, i32 -> vector<8x16xf32>
    %c1_i32_31 = arith.constant 1 : i32
    %66 = vector.broadcast %c1_i32_31 : i32 to vector<8x16xi32>
    %67 = arith.cmpi sge, %62, %66 : vector<8x16xi32>
    %cst_32 = arith.constant 0.000000e+00 : f32
    %68 = vector.broadcast %cst_32 : f32 to vector<8x16xf32>
    %69 = arith.select %67, %65, %68 : vector<8x16xi1>, vector<8x16xf32>
    %c200 = arith.constant 200 : index
    %c0_33 = arith.constant 0 : index
    %70 = vector.load %arg2[%c200, %c0_33] : memref<448x128xbf16, #tpu.memory_space<vmem>>, vector<32x16xbf16>
    %cst_34 = arith.constant dense<0.000000e+00> : vector<8x16xf32>
    %71 = tpu.matmul %59, %70, %cst_34 {dimension_numbers = #tpu.dot_dimension_numbers<[1], [0], [0], [1], [0, 0, 1, 1], [], []>} : vector<8x32xbf16>, vector<32x16xbf16>, vector<8x16xf32> -> vector<8x16xf32>
    %72 = arith.addf %69, %71 : vector<8x16xf32>
    %c232 = arith.constant 232 : index
    %c0_35 = arith.constant 0 : index
    %73 = vector.load %arg2[%c232, %c0_35] : memref<448x128xbf16, #tpu.memory_space<vmem>>, vector<32x16xbf16>
    %cst_36 = arith.constant dense<0.000000e+00> : vector<8x16xf32>
    %74 = tpu.matmul %59, %73, %cst_36 {dimension_numbers = #tpu.dot_dimension_numbers<[1], [0], [0], [1], [0, 0, 1, 1], [], []>} : vector<8x32xbf16>, vector<32x16xbf16>, vector<8x16xf32> -> vector<8x16xf32>
    %c7_i32_37 = arith.constant 7 : i32
    %75 = tpu.dynamic_rotate %74 by %c7_i32_37 dim 0 : vector<8x16xf32>, i32 -> vector<8x16xf32>
    %c2_i32 = arith.constant 2 : i32
    %76 = vector.broadcast %c2_i32 : i32 to vector<8x16xi32>
    %77 = arith.cmpi sle, %62, %76 : vector<8x16xi32>
    %cst_38 = arith.constant 0.000000e+00 : f32
    %78 = vector.broadcast %cst_38 : f32 to vector<8x16xf32>
    %79 = arith.select %77, %75, %78 : vector<8x16xi1>, vector<8x16xf32>
    %80 = arith.addf %72, %79 : vector<8x16xf32>
    %c2 = arith.constant 2 : index
    %c0_39 = arith.constant 0 : index
    %81 = vector.load %arg3[%c2, %c0_39] : memref<8x128xf32, #tpu.memory_space<vmem>>, vector<1x16xf32>
    %82 = vector.broadcast %81 : vector<1x16xf32> to vector<8x16xf32>
    %83 = arith.addf %80, %82 : vector<8x16xf32>
    %cst_40 = arith.constant 0.000000e+00 : f32
    %84 = vector.broadcast %cst_40 : f32 to vector<8x16xf32>
    %85 = arith.maximumf %83, %84 : vector<8x16xf32>
    %86 = vector.shape_cast %85 : vector<8x16xf32> to vector<4x2x16xf32>
    %cst_41 = arith.constant dense<0xFF800000> : vector<4x16xf32>
    %87 = vector.multi_reduction <maximumf>, %86, %cst_41 [1] : vector<4x2x16xf32> to vector<4x16xf32>
    %c264 = arith.constant 264 : index
    %c0_42 = arith.constant 0 : index
    %88 = vector.load %arg2[%c264, %c0_42] : memref<448x128xbf16, #tpu.memory_space<vmem>>, vector<16x80xbf16>
    %c280 = arith.constant 280 : index
    %c0_43 = arith.constant 0 : index
    %89 = vector.load %arg2[%c280, %c0_43] : memref<448x128xbf16, #tpu.memory_space<vmem>>, vector<20x80xbf16>
    %c3 = arith.constant 3 : index
    %c0_44 = arith.constant 0 : index
    %90 = vector.load %arg3[%c3, %c0_44] : memref<8x128xf32, #tpu.memory_space<vmem>>, vector<1x80xf32>
    %91 = arith.truncf %87 : vector<4x16xf32> to vector<4x16xbf16>
    %cst_45 = arith.constant dense<0.000000e+00> : vector<4x80xf32>
    %92 = tpu.matmul %91, %88, %cst_45 {dimension_numbers = #tpu.dot_dimension_numbers<[1], [0], [0], [1], [0, 0, 1, 1], [], []>} : vector<4x16xbf16>, vector<16x80xbf16>, vector<4x80xf32> -> vector<4x80xf32>
    %93 = vector.broadcast %90 : vector<1x80xf32> to vector<4x80xf32>
    %94 = arith.addf %92, %93 : vector<4x80xf32>
    %95 = vector.shape_cast %94 : vector<4x80xf32> to vector<2x2x80xf32>
    %cst_46 = arith.constant 0.000000e+00 : f32
    %96 = vector.broadcast %cst_46 : f32 to vector<2x20xf32>
    %cst_47 = arith.constant 0.000000e+00 : f32
    %97 = vector.broadcast %cst_47 : f32 to vector<2x20xf32>
    %98 = vector.extract_strided_slice %95 {offsets = [0, 0, 0], sizes = [2, 1, 80], strides = [1, 1, 1]} : vector<2x2x80xf32> to vector<2x1x80xf32>
    %99 = vector.shape_cast %98 : vector<2x1x80xf32> to vector<2x80xf32>
    %100 = arith.truncf %96 : vector<2x20xf32> to vector<2x20xbf16>
    %cst_48 = arith.constant dense<0.000000e+00> : vector<2x80xf32>
    %101 = tpu.matmul %100, %89, %cst_48 {dimension_numbers = #tpu.dot_dimension_numbers<[1], [0], [0], [1], [0, 0, 1, 1], [], []>} : vector<2x20xbf16>, vector<20x80xbf16>, vector<2x80xf32> -> vector<2x80xf32>
    %102 = arith.addf %99, %101 : vector<2x80xf32>
    %103 = vector.extract_strided_slice %102 {offsets = [0, 0], sizes = [2, 60], strides = [1, 1]} : vector<2x80xf32> to vector<2x60xf32>
    %104 = arith.negf %103 : vector<2x60xf32>
    %105 = math.exp %104 : vector<2x60xf32>
    %cst_49 = arith.constant 1.000000e+00 : f32
    %106 = vector.broadcast %cst_49 : f32 to vector<2x60xf32>
    %107 = arith.addf %106, %105 : vector<2x60xf32>
    %108 = arith.divf %106, %107 : vector<2x60xf32>
    %109 = vector.extract_strided_slice %102 {offsets = [0, 60], sizes = [2, 20], strides = [1, 1]} : vector<2x80xf32> to vector<2x20xf32>
    %110 = math.tanh %109 : vector<2x20xf32>
    %111 = vector.extract_strided_slice %108 {offsets = [0, 20], sizes = [2, 20], strides = [1, 1]} : vector<2x60xf32> to vector<2x20xf32>
    %112 = arith.mulf %111, %97 : vector<2x20xf32>
    %113 = vector.extract_strided_slice %108 {offsets = [0, 0], sizes = [2, 20], strides = [1, 1]} : vector<2x60xf32> to vector<2x20xf32>
    %114 = arith.mulf %113, %110 : vector<2x20xf32>
    %115 = arith.addf %112, %114 : vector<2x20xf32>
    %116 = vector.extract_strided_slice %108 {offsets = [0, 40], sizes = [2, 20], strides = [1, 1]} : vector<2x60xf32> to vector<2x20xf32>
    %117 = math.tanh %115 : vector<2x20xf32>
    %118 = arith.mulf %116, %117 : vector<2x20xf32>
    %119 = vector.extract_strided_slice %95 {offsets = [0, 1, 0], sizes = [2, 1, 80], strides = [1, 1, 1]} : vector<2x2x80xf32> to vector<2x1x80xf32>
    %120 = vector.shape_cast %119 : vector<2x1x80xf32> to vector<2x80xf32>
    %121 = arith.truncf %118 : vector<2x20xf32> to vector<2x20xbf16>
    %cst_50 = arith.constant dense<0.000000e+00> : vector<2x80xf32>
    %122 = tpu.matmul %121, %89, %cst_50 {dimension_numbers = #tpu.dot_dimension_numbers<[1], [0], [0], [1], [0, 0, 1, 1], [], []>} : vector<2x20xbf16>, vector<20x80xbf16>, vector<2x80xf32> -> vector<2x80xf32>
    %123 = arith.addf %120, %122 : vector<2x80xf32>
    %124 = vector.extract_strided_slice %123 {offsets = [0, 0], sizes = [2, 60], strides = [1, 1]} : vector<2x80xf32> to vector<2x60xf32>
    %125 = arith.negf %124 : vector<2x60xf32>
    %126 = math.exp %125 : vector<2x60xf32>
    %cst_51 = arith.constant 1.000000e+00 : f32
    %127 = vector.broadcast %cst_51 : f32 to vector<2x60xf32>
    %128 = arith.addf %127, %126 : vector<2x60xf32>
    %129 = arith.divf %127, %128 : vector<2x60xf32>
    %130 = vector.extract_strided_slice %123 {offsets = [0, 60], sizes = [2, 20], strides = [1, 1]} : vector<2x80xf32> to vector<2x20xf32>
    %131 = math.tanh %130 : vector<2x20xf32>
    %132 = vector.extract_strided_slice %129 {offsets = [0, 20], sizes = [2, 20], strides = [1, 1]} : vector<2x60xf32> to vector<2x20xf32>
    %133 = arith.mulf %132, %115 : vector<2x20xf32>
    %134 = vector.extract_strided_slice %129 {offsets = [0, 0], sizes = [2, 20], strides = [1, 1]} : vector<2x60xf32> to vector<2x20xf32>
    %135 = arith.mulf %134, %131 : vector<2x20xf32>
    %136 = arith.addf %133, %135 : vector<2x20xf32>
    %137 = vector.extract_strided_slice %129 {offsets = [0, 40], sizes = [2, 20], strides = [1, 1]} : vector<2x60xf32> to vector<2x20xf32>
    %138 = math.tanh %136 : vector<2x20xf32>
    %139 = arith.mulf %137, %138 : vector<2x20xf32>
    %140 = vector.shape_cast %118 : vector<2x20xf32> to vector<2x1x20xf32>
    %141 = vector.shape_cast %139 : vector<2x20xf32> to vector<2x1x20xf32>
    %142 = tpu.concatenate %140, %141 in 1 : vector<2x1x20xf32>, vector<2x1x20xf32> -> vector<2x2x20xf32>
    %143 = vector.shape_cast %142 : vector<2x2x20xf32> to vector<4x20xf32>
    %c304 = arith.constant 304 : index
    %c0_52 = arith.constant 0 : index
    %144 = vector.load %arg2[%c304, %c0_52] : memref<448x128xbf16, #tpu.memory_space<vmem>>, vector<20x80xbf16>
    %c328 = arith.constant 328 : index
    %c0_53 = arith.constant 0 : index
    %145 = vector.load %arg2[%c328, %c0_53] : memref<448x128xbf16, #tpu.memory_space<vmem>>, vector<20x80xbf16>
    %c4 = arith.constant 4 : index
    %c0_54 = arith.constant 0 : index
    %146 = vector.load %arg3[%c4, %c0_54] : memref<8x128xf32, #tpu.memory_space<vmem>>, vector<1x80xf32>
    %147 = arith.truncf %143 : vector<4x20xf32> to vector<4x20xbf16>
    %cst_55 = arith.constant dense<0.000000e+00> : vector<4x80xf32>
    %148 = tpu.matmul %147, %144, %cst_55 {dimension_numbers = #tpu.dot_dimension_numbers<[1], [0], [0], [1], [0, 0, 1, 1], [], []>} : vector<4x20xbf16>, vector<20x80xbf16>, vector<4x80xf32> -> vector<4x80xf32>
    %149 = vector.broadcast %146 : vector<1x80xf32> to vector<4x80xf32>
    %150 = arith.addf %148, %149 : vector<4x80xf32>
    %151 = vector.shape_cast %150 : vector<4x80xf32> to vector<2x2x80xf32>
    %cst_56 = arith.constant 0.000000e+00 : f32
    %152 = vector.broadcast %cst_56 : f32 to vector<2x20xf32>
    %cst_57 = arith.constant 0.000000e+00 : f32
    %153 = vector.broadcast %cst_57 : f32 to vector<2x20xf32>
    %154 = vector.extract_strided_slice %151 {offsets = [0, 0, 0], sizes = [2, 1, 80], strides = [1, 1, 1]} : vector<2x2x80xf32> to vector<2x1x80xf32>
    %155 = vector.shape_cast %154 : vector<2x1x80xf32> to vector<2x80xf32>
    %156 = arith.truncf %152 : vector<2x20xf32> to vector<2x20xbf16>
    %cst_58 = arith.constant dense<0.000000e+00> : vector<2x80xf32>
    %157 = tpu.matmul %156, %145, %cst_58 {dimension_numbers = #tpu.dot_dimension_numbers<[1], [0], [0], [1], [0, 0, 1, 1], [], []>} : vector<2x20xbf16>, vector<20x80xbf16>, vector<2x80xf32> -> vector<2x80xf32>
    %158 = arith.addf %155, %157 : vector<2x80xf32>
    %159 = vector.extract_strided_slice %158 {offsets = [0, 0], sizes = [2, 60], strides = [1, 1]} : vector<2x80xf32> to vector<2x60xf32>
    %160 = arith.negf %159 : vector<2x60xf32>
    %161 = math.exp %160 : vector<2x60xf32>
    %cst_59 = arith.constant 1.000000e+00 : f32
    %162 = vector.broadcast %cst_59 : f32 to vector<2x60xf32>
    %163 = arith.addf %162, %161 : vector<2x60xf32>
    %164 = arith.divf %162, %163 : vector<2x60xf32>
    %165 = vector.extract_strided_slice %158 {offsets = [0, 60], sizes = [2, 20], strides = [1, 1]} : vector<2x80xf32> to vector<2x20xf32>
    %166 = math.tanh %165 : vector<2x20xf32>
    %167 = vector.extract_strided_slice %164 {offsets = [0, 20], sizes = [2, 20], strides = [1, 1]} : vector<2x60xf32> to vector<2x20xf32>
    %168 = arith.mulf %167, %153 : vector<2x20xf32>
    %169 = vector.extract_strided_slice %164 {offsets = [0, 0], sizes = [2, 20], strides = [1, 1]} : vector<2x60xf32> to vector<2x20xf32>
    %170 = arith.mulf %169, %166 : vector<2x20xf32>
    %171 = arith.addf %168, %170 : vector<2x20xf32>
    %172 = vector.extract_strided_slice %164 {offsets = [0, 40], sizes = [2, 20], strides = [1, 1]} : vector<2x60xf32> to vector<2x20xf32>
    %173 = math.tanh %171 : vector<2x20xf32>
    %174 = arith.mulf %172, %173 : vector<2x20xf32>
    %175 = vector.extract_strided_slice %151 {offsets = [0, 1, 0], sizes = [2, 1, 80], strides = [1, 1, 1]} : vector<2x2x80xf32> to vector<2x1x80xf32>
    %176 = vector.shape_cast %175 : vector<2x1x80xf32> to vector<2x80xf32>
    %177 = arith.truncf %174 : vector<2x20xf32> to vector<2x20xbf16>
    %cst_60 = arith.constant dense<0.000000e+00> : vector<2x80xf32>
    %178 = tpu.matmul %177, %145, %cst_60 {dimension_numbers = #tpu.dot_dimension_numbers<[1], [0], [0], [1], [0, 0, 1, 1], [], []>} : vector<2x20xbf16>, vector<20x80xbf16>, vector<2x80xf32> -> vector<2x80xf32>
    %179 = arith.addf %176, %178 : vector<2x80xf32>
    %180 = vector.extract_strided_slice %179 {offsets = [0, 0], sizes = [2, 60], strides = [1, 1]} : vector<2x80xf32> to vector<2x60xf32>
    %181 = arith.negf %180 : vector<2x60xf32>
    %182 = math.exp %181 : vector<2x60xf32>
    %cst_61 = arith.constant 1.000000e+00 : f32
    %183 = vector.broadcast %cst_61 : f32 to vector<2x60xf32>
    %184 = arith.addf %183, %182 : vector<2x60xf32>
    %185 = arith.divf %183, %184 : vector<2x60xf32>
    %186 = vector.extract_strided_slice %179 {offsets = [0, 60], sizes = [2, 20], strides = [1, 1]} : vector<2x80xf32> to vector<2x20xf32>
    %187 = math.tanh %186 : vector<2x20xf32>
    %188 = vector.extract_strided_slice %185 {offsets = [0, 20], sizes = [2, 20], strides = [1, 1]} : vector<2x60xf32> to vector<2x20xf32>
    %189 = arith.mulf %188, %171 : vector<2x20xf32>
    %190 = vector.extract_strided_slice %185 {offsets = [0, 0], sizes = [2, 20], strides = [1, 1]} : vector<2x60xf32> to vector<2x20xf32>
    %191 = arith.mulf %190, %187 : vector<2x20xf32>
    %192 = arith.addf %189, %191 : vector<2x20xf32>
    %193 = vector.extract_strided_slice %185 {offsets = [0, 40], sizes = [2, 20], strides = [1, 1]} : vector<2x60xf32> to vector<2x20xf32>
    %194 = math.tanh %192 : vector<2x20xf32>
    %195 = arith.mulf %193, %194 : vector<2x20xf32>
    %196 = vector.shape_cast %174 : vector<2x20xf32> to vector<2x1x20xf32>
    %197 = vector.shape_cast %195 : vector<2x20xf32> to vector<2x1x20xf32>
    %198 = tpu.concatenate %196, %197 in 1 : vector<2x1x20xf32>, vector<2x1x20xf32> -> vector<2x2x20xf32>
    %199 = vector.shape_cast %198 : vector<2x2x20xf32> to vector<4x20xf32>
    %c352 = arith.constant 352 : index
    %c0_62 = arith.constant 0 : index
    %200 = vector.load %arg2[%c352, %c0_62] : memref<448x128xbf16, #tpu.memory_space<vmem>>, vector<20x80xbf16>
    %c376 = arith.constant 376 : index
    %c0_63 = arith.constant 0 : index
    %201 = vector.load %arg2[%c376, %c0_63] : memref<448x128xbf16, #tpu.memory_space<vmem>>, vector<20x80xbf16>
    %c5 = arith.constant 5 : index
    %c0_64 = arith.constant 0 : index
    %202 = vector.load %arg3[%c5, %c0_64] : memref<8x128xf32, #tpu.memory_space<vmem>>, vector<1x80xf32>
    %203 = arith.truncf %199 : vector<4x20xf32> to vector<4x20xbf16>
    %cst_65 = arith.constant dense<0.000000e+00> : vector<4x80xf32>
    %204 = tpu.matmul %203, %200, %cst_65 {dimension_numbers = #tpu.dot_dimension_numbers<[1], [0], [0], [1], [0, 0, 1, 1], [], []>} : vector<4x20xbf16>, vector<20x80xbf16>, vector<4x80xf32> -> vector<4x80xf32>
    %205 = vector.broadcast %202 : vector<1x80xf32> to vector<4x80xf32>
    %206 = arith.addf %204, %205 : vector<4x80xf32>
    %207 = vector.shape_cast %206 : vector<4x80xf32> to vector<2x2x80xf32>
    %cst_66 = arith.constant 0.000000e+00 : f32
    %208 = vector.broadcast %cst_66 : f32 to vector<2x20xf32>
    %cst_67 = arith.constant 0.000000e+00 : f32
    %209 = vector.broadcast %cst_67 : f32 to vector<2x20xf32>
    %210 = vector.extract_strided_slice %207 {offsets = [0, 0, 0], sizes = [2, 1, 80], strides = [1, 1, 1]} : vector<2x2x80xf32> to vector<2x1x80xf32>
    %211 = vector.shape_cast %210 : vector<2x1x80xf32> to vector<2x80xf32>
    %212 = arith.truncf %208 : vector<2x20xf32> to vector<2x20xbf16>
    %cst_68 = arith.constant dense<0.000000e+00> : vector<2x80xf32>
    %213 = tpu.matmul %212, %201, %cst_68 {dimension_numbers = #tpu.dot_dimension_numbers<[1], [0], [0], [1], [0, 0, 1, 1], [], []>} : vector<2x20xbf16>, vector<20x80xbf16>, vector<2x80xf32> -> vector<2x80xf32>
    %214 = arith.addf %211, %213 : vector<2x80xf32>
    %215 = vector.extract_strided_slice %214 {offsets = [0, 0], sizes = [2, 60], strides = [1, 1]} : vector<2x80xf32> to vector<2x60xf32>
    %216 = arith.negf %215 : vector<2x60xf32>
    %217 = math.exp %216 : vector<2x60xf32>
    %cst_69 = arith.constant 1.000000e+00 : f32
    %218 = vector.broadcast %cst_69 : f32 to vector<2x60xf32>
    %219 = arith.addf %218, %217 : vector<2x60xf32>
    %220 = arith.divf %218, %219 : vector<2x60xf32>
    %221 = vector.extract_strided_slice %214 {offsets = [0, 60], sizes = [2, 20], strides = [1, 1]} : vector<2x80xf32> to vector<2x20xf32>
    %222 = math.tanh %221 : vector<2x20xf32>
    %223 = vector.extract_strided_slice %220 {offsets = [0, 20], sizes = [2, 20], strides = [1, 1]} : vector<2x60xf32> to vector<2x20xf32>
    %224 = arith.mulf %223, %209 : vector<2x20xf32>
    %225 = vector.extract_strided_slice %220 {offsets = [0, 0], sizes = [2, 20], strides = [1, 1]} : vector<2x60xf32> to vector<2x20xf32>
    %226 = arith.mulf %225, %222 : vector<2x20xf32>
    %227 = arith.addf %224, %226 : vector<2x20xf32>
    %228 = vector.extract_strided_slice %220 {offsets = [0, 40], sizes = [2, 20], strides = [1, 1]} : vector<2x60xf32> to vector<2x20xf32>
    %229 = math.tanh %227 : vector<2x20xf32>
    %230 = arith.mulf %228, %229 : vector<2x20xf32>
    %231 = vector.extract_strided_slice %207 {offsets = [0, 1, 0], sizes = [2, 1, 80], strides = [1, 1, 1]} : vector<2x2x80xf32> to vector<2x1x80xf32>
    %232 = vector.shape_cast %231 : vector<2x1x80xf32> to vector<2x80xf32>
    %233 = arith.truncf %230 : vector<2x20xf32> to vector<2x20xbf16>
    %cst_70 = arith.constant dense<0.000000e+00> : vector<2x80xf32>
    %234 = tpu.matmul %233, %201, %cst_70 {dimension_numbers = #tpu.dot_dimension_numbers<[1], [0], [0], [1], [0, 0, 1, 1], [], []>} : vector<2x20xbf16>, vector<20x80xbf16>, vector<2x80xf32> -> vector<2x80xf32>
    %235 = arith.addf %232, %234 : vector<2x80xf32>
    %236 = vector.extract_strided_slice %235 {offsets = [0, 0], sizes = [2, 60], strides = [1, 1]} : vector<2x80xf32> to vector<2x60xf32>
    %237 = arith.negf %236 : vector<2x60xf32>
    %238 = math.exp %237 : vector<2x60xf32>
    %cst_71 = arith.constant 1.000000e+00 : f32
    %239 = vector.broadcast %cst_71 : f32 to vector<2x60xf32>
    %240 = arith.addf %239, %238 : vector<2x60xf32>
    %241 = arith.divf %239, %240 : vector<2x60xf32>
    %242 = vector.extract_strided_slice %235 {offsets = [0, 60], sizes = [2, 20], strides = [1, 1]} : vector<2x80xf32> to vector<2x20xf32>
    %243 = math.tanh %242 : vector<2x20xf32>
    %244 = vector.extract_strided_slice %241 {offsets = [0, 20], sizes = [2, 20], strides = [1, 1]} : vector<2x60xf32> to vector<2x20xf32>
    %245 = arith.mulf %244, %227 : vector<2x20xf32>
    %246 = vector.extract_strided_slice %241 {offsets = [0, 0], sizes = [2, 20], strides = [1, 1]} : vector<2x60xf32> to vector<2x20xf32>
    %247 = arith.mulf %246, %243 : vector<2x20xf32>
    %248 = arith.addf %245, %247 : vector<2x20xf32>
    %249 = vector.extract_strided_slice %241 {offsets = [0, 40], sizes = [2, 20], strides = [1, 1]} : vector<2x60xf32> to vector<2x20xf32>
    %250 = math.tanh %248 : vector<2x20xf32>
    %251 = arith.mulf %249, %250 : vector<2x20xf32>
    %c400 = arith.constant 400 : index
    %c0_72 = arith.constant 0 : index
    %252 = vector.load %arg2[%c400, %c0_72] : memref<448x128xbf16, #tpu.memory_space<vmem>>, vector<20x20xbf16>
    %c6 = arith.constant 6 : index
    %c0_73 = arith.constant 0 : index
    %253 = vector.load %arg3[%c6, %c0_73] : memref<8x128xf32, #tpu.memory_space<vmem>>, vector<1x20xf32>
    %c424 = arith.constant 424 : index
    %c0_74 = arith.constant 0 : index
    %254 = vector.load %arg2[%c424, %c0_74] : memref<448x128xbf16, #tpu.memory_space<vmem>>, vector<20x1xbf16>
    %c7 = arith.constant 7 : index
    %c0_75 = arith.constant 0 : index
    %255 = vector.load %arg3[%c7, %c0_75] : memref<8x128xf32, #tpu.memory_space<vmem>>, vector<1x1xf32>
    %256 = arith.truncf %251 : vector<2x20xf32> to vector<2x20xbf16>
    %cst_76 = arith.constant dense<0.000000e+00> : vector<2x20xf32>
    %257 = tpu.matmul %256, %252, %cst_76 {dimension_numbers = #tpu.dot_dimension_numbers<[1], [0], [0], [1], [0, 0, 1, 1], [], []>} : vector<2x20xbf16>, vector<20x20xbf16>, vector<2x20xf32> -> vector<2x20xf32>
    %258 = vector.broadcast %253 : vector<1x20xf32> to vector<2x20xf32>
    %259 = arith.addf %257, %258 : vector<2x20xf32>
    %cst_77 = arith.constant 0.000000e+00 : f32
    %260 = vector.broadcast %cst_77 : f32 to vector<2x20xf32>
    %261 = arith.maximumf %259, %260 : vector<2x20xf32>
    %262 = arith.truncf %261 : vector<2x20xf32> to vector<2x20xbf16>
    %cst_78 = arith.constant dense<0.000000e+00> : vector<2x1xf32>
    %263 = tpu.matmul %262, %254, %cst_78 {dimension_numbers = #tpu.dot_dimension_numbers<[1], [0], [0], [1], [0, 0, 1, 1], [], []>} : vector<2x20xbf16>, vector<20x1xbf16>, vector<2x1xf32> -> vector<2x1xf32>
    %264 = vector.broadcast %255 : vector<1x1xf32> to vector<2x1xf32>
    %265 = arith.addf %263, %264 : vector<2x1xf32>
    %c0_79 = arith.constant 0 : index
    %c0_80 = arith.constant 0 : index
    %266 = vector.load %arg4[%c0_79, %c0_80] : memref<2x1xf32, #tpu.memory_space<vmem>>, vector<2x1xf32>
    tpu.vector_store %arg4[%c0_79, %c0_80], %265 {strides = array<i32>} : memref<2x1xf32, #tpu.memory_space<vmem>>, vector<2x1xf32>,
    return
  }
  func.func @transform_0(%arg0: i32) -> (i32, i32) {
    %c0_i32 = arith.constant 0 : i32
    %c0_i32_0 = arith.constant 0 : i32
    %c0_i32_1 = arith.constant 0 : i32
    return %c0_i32, %c0_i32_0 : i32, i32
  }
  func.func @transform_1(%arg0: i32) -> (i32, i32) {
    %c0_i32 = arith.constant 0 : i32
    %c0_i32_0 = arith.constant 0 : i32
    %c0_i32_1 = arith.constant 0 : i32
    return %c0_i32, %c0_i32_0 : i32, i32
  }
  func.func @transform_2(%arg0: i32) -> (i32, i32) {
    %c0_i32 = arith.constant 0 : i32
    %c0_i32_0 = arith.constant 0 : i32
    %c0_i32_1 = arith.constant 0 : i32
    return %c0_i32, %c0_i32_0 : i32, i32
  }
  func.func @transform_3(%arg0: i32) -> (i32, i32) {
    %c0_i32 = arith.constant 0 : i32
    %c0_i32_0 = arith.constant 0 : i32
    %c0_i32_1 = arith.constant 0 : i32
    return %c0_i32, %c0_i32_0 : i32, i32
  }
}

</mosaic_0001>

<bundles_post_ra>
// kernel: tpu_custom_call.1
= control target key start
LH: loop header
LB: loop body
LE: loop exit
PB: predicated region body
PF: predicated region fallthrough
CT: control target
= control target key end

     0   :  { %8 = vsyncpa [#allocation3], 0  ;;  %s2720_s12 = smov [#allocation2]   ;;  %s3169_s0 = inlined_call_operand.vmem [shape: f32[32,4], index: 0, kind: input, shape index: {}]   ;;  %s3170_s1 = inlined_call_operand.hbm [shape: bf16[448,128], index: 1, kind: input, shape index: {}]   ;;  %s3171_s2 = inlined_call_operand.vmem [shape: f32[8,128], index: 2, kind: input, shape index: {}]   ;;  %s3172_s3 = inlined_call_operand.vmem [shape: f32[2,1], index: 3, kind: output, shape index: {}]  }
   0x1   :  { %s16_s13 = sshll.u32 %s2720_s12, 4  ;;  %s2696_s16 = scalar_lea.hbm %s3170_s1, 3584  ;;  %s17_s13 = int_to_ptr.vmem [resolvable:$true] %s16_s13 }
   0x2   :  { %p2697_p0 = scmp.ne.s32.totalorder %s3170_s1, %s2696_s16  ;;  %p2700_p1 = scmp.lt.u32.totalorder %s2696_s16, %s3170_s1 }
   0x4   :  { %p2702_p2 = pnand %p2700_p1, %p2697_p0 }
   0x6   :  { %2705 = shalt.err (!%p2702_p2)
}
   0x7   :  { %s2706_s21 = scalar_lea.vmem %s17_s13, 3584  ;;  %p2711_p4 = scmp.lt.s32.totalorder %s17_s13, %s17_s13 }
   0x8   :  { %p2707_p3 = scmp.ne.s32.totalorder %s17_s13, %s2706_s21  ;;  %p2712_p5 = scmp.lt.s32.totalorder %s2706_s21, %s2706_s21 }
   0xa   :  { %p2713_p6 = por %p2712_p5, %p2711_p4 }
   0xc   :  { %p2714_p7 = pnand %p2713_p6, %p2707_p3 }
   0xe   :  { %2717 = shalt.err (!%p2714_p7)
}
   0xf   :  { %s2721_s22 = smov 64   ;;  %s2722_s23 = smov 4  }
  0x10   :  { %22 = dma.hbm_to_vmem [thread:$0]  %s3170_s1, 3584, %s17_s13, [#allocation3], %s2721_s22, %s2721_s22, %s2722_s23  }
  0x11   :  { %2718 = dma.done.wait [#allocation3], 3584  }
  0x12   :  { %2719 = vsyncadd [#allocation3], 4294963712  ;;  %vm52_vm0 = vcmask 1041408   ;;  %v44_v0 = vld [vmem:[#allocation2] sm:$0x3]  ;;  %v30_v2 = vld [vmem:[%s3169_s0 + $0x8] sm:$0xff]  ;;  %v35_v19 = vlaneseq }
  0x13   :  { %v29_v1 = vld [vmem:[%s3169_s0] sm:$0xff]  ;;  %vm45_vm1 = vcmask 31744   ;;  %2557 = vmatprep.subr.msk.bf16.mxu0 %vm52_vm0, %v44_v0  ;;  %v54_v3 = vsel %vm52_vm0, %v44_v0, 0  ;;  %v31_v6 = vld [vmem:[%s3169_s0 + $0x10] sm:$0xff]  ;;  %v32_v7 = vld [vmem:[%s3169_s0 + $0x18] sm:$0xff]  ;;  %v2723_v13 = vmov 0.0  }
  0x14   :  { %v33_v4 = vpack.c.bf16 %v30_v2, %v29_v1  ;;  %v122_v5 = vld [vmem:[#allocation2 + $0x4] sm:$0x3]  ;;  %2400 = vmatpush3.bf16.msra.mxu0 %v54_v3  ;;  %v34_v8 = vpack.c.bf16 %v32_v7, %v31_v6  ;;  %v179_v10 = vld [vmem:[#allocation2 + $0x8] sm:$0x3]  ;;  %v2570_v12 = vld [vmem:[#allocation2 + $0xc] sm:$0xff]   ;;  %vm2724_vm2 = vmmov 0  }
  0x15   :  { %2558 = vmatprep.subr.msk.bf16.mxu1 %vm52_vm0, %v122_v5  ;;  %v124_v9 = vsel %vm52_vm0, %v122_v5, 0  ;;  %v181_v11 = vsel %vm52_vm0, %v179_v10, 0  ;;  %2559 = vmatprep.subr.msk.bf16.mxu0 %vm52_vm0, %v179_v10  ;;  %v2571_v14 = vld [vmem:[#allocation2 + $0x24] sm:$0xff]   ;;  %v2572_v15 = vld [vmem:[#allocation2 + $0x14] sm:$0xff]   ;;  %v2573_v16 = vld [vmem:[#allocation2 + $0x2c] sm:$0xff]   ;;  %v2798_v20 = vshrl.u32 %v35_v19, 7 }
  0x16   :  { %2401 = vmatprep.mubr.msk.bf16.mxu0 %vm45_vm1, %v33_v4  ;;  %2406 = vmatpush3.bf16.msra.mxu1 %v124_v9  ;;  %v2574_v17 = vld [vmem:[#allocation2 + $0x1c] sm:$0xff]   ;;  %v2575_v18 = vld [vmem:[#allocation2 + $0x34] sm:$0xff]   ;;  %v2725_v49 = vmov 1983009808   ;;  %vm354_vm9 = vcmask 386048   ;;  %vm523_vm10 = vcmask 1041409  }
  0x17   :  { %2407 = vmatprep.mubr.msk.bf16.mxu1 %vm45_vm1, %v33_v4  ;;  %2402 = vmatmul.mubr.msk.bf16.vlgmr.msra.gmra.mrb[0].mxu0 %vm45_vm1, %v34_v8  ;;  %v38_v21 = vadd.s32 16, %v2798_v20  ;;  %v40_v22 = vand.u32 15, %v2798_v20  ;;  %vm109_vm3 = vcmp.lt.s32.totalorder %v2798_v20, 1  ;;  %v39_v34 = vadd.s32 24, %v2798_v20  ;;  %v2273_v63 = vld [vmem:[%s3171_s2] ss:$0 sm:$0xff] }
  0x18   :  { %2412 = vmatpush3.bf16.msra.mxu0 %v181_v11  ;;  %2413 = vmatprep.mubr.msk.bf16.mxu0 %vm45_vm1, %v33_v4  ;;  %v2805_v37 = vadd.s32 8, %v2798_v20  ;;  %v272_v50 = vunpack.c.l.s4 %v2725_v49  ;;  %vm236_vm6 = vcmp.lt.s32.totalorder %v2798_v20, 7  ;;  %vm525_vm11 = vcmask 1042434   ;;  %s2727_s13 = smov 68   ;;  %s2728_s14 = smov 20  }
  0x19   :  { %2408 = vmatmul.mubr.msk.bf16.vlgmr.msra.gmra.mrb[0].mxu1 %vm45_vm1, %v34_v8  ;;  %2417 = vmatprep.subr.bf16.mxu1 %v2723_v13  ;;  %v42_v24 = vand.u32 15, %v38_v21  ;;  %vm114_vm4 = vcmp.ge.s32.totalorder %v40_v22, 1  ;;  %v43_v47 = vand.u32 15, %v39_v34  ;;  %vm527_vm12 = vcmask 1043459   ;;  %s2729_s15 = smov 88  }
  0x1a   :  { %2427 = vmatprep.subr.bf16.mxu0 %v2723_v13  ;;  %2418 = vmatpush3.bf16.msra.mxu1 %v2570_v12  ;;  %v41_v52 = vand.u32 15, %v2805_v37  ;;  %v273_v59 = vunpack.c.0.s8 %v272_v50  ;;  %vm529_vm13 = vcmask 1044484   ;;  %vm531_vm14 = vcmask 1045509  }
  0x1b   :  { %2419 = vmatprep.subr.bf16.mxu1 %v2723_v13  ;;  %2423 = vmatprep.mubr.msk.bf16.mxu1 %vm2724_vm2, %v2723_v13  ;;  %vm116_vm5 = vcmp.ge.s32.totalorder %v42_v24, 1  ;;  %vm244_vm7 = vcmp.le.s32.totalorder %v43_v47, 14  ;;  %vm533_vm15 = vcmask 1046534  }
  0x1c   :  { %vm242_vm8 = vcmp.le.s32.totalorder %v41_v52, 14  ;;  %v2829_v7 = vsub.s32 %v273_v59, %v2798_v20 }
  0x1e   :  { %2420 = vmatpush3.bf16.msra.mxu1 %v2572_v15 }
  0x1f   :  { %2414 = vmatmul.mubr.msk.bf16.vlgmr.msra.gmra.mrb[4].mxu0 %vm45_vm1, %v34_v8  ;;  %2421 = vmatprep.subr.bf16.mxu1 %v2723_v13  ;;  %vm535_vm1 = vcmask 1047559  }
  0x20   :  { %2428 = vmatpush3.bf16.msra.mxu0 %v2571_v14  ;;  %2433 = vmatprep.mubr.msk.bf16.mxu0 %vm2724_vm2, %v2723_v13 }
  0x21   :  { %2429 = vmatprep.subr.bf16.mxu0 %v2723_v13 }
  0x22   :  { %2422 = vmatpush3.bf16.msra.mxu1 %v2574_v17 }
  0x23   :  { %2437 = vmatprep.subr.bf16.mxu1 %v2723_v13 }
  0x24   :  { %2430 = vmatpush3.bf16.msra.mxu0 %v2573_v16 }
  0x25   :  { %2431 = vmatprep.subr.bf16.mxu0 %v2723_v13 }
  0x28   :  { %2432 = vmatpush3.bf16.msra.mxu0 %v2575_v18 }
  0x29   :  { %2447 = vmatprep.subr.bf16.mxu0 %v2723_v13 }
  0xea   :  { %v2403_v23 = vpop.f32.mrb[0].mxu0 }
  0xeb   :  { %v90_v25 = vpop.f32.mrb[1].mxu0  ;;  %v107_v30 = vrot.slane %v2403_v23, 7 }
  0xec   :  { %v2409_v26 = vpop.f32.mrb[0].mxu1  ;;  %v105_v27 = vrot.slane %v90_v25, 7  ;;  %v2404_v28 = vpop.f32.mrb[2].mxu0 }
  0xed   :  { %v160_v29 = vpop.f32.mrb[1].mxu1  ;;  %v108_v31 = vrot.slane %v2404_v28, 7  ;;  %v93_v32 = vpop.f32.mrb[3].mxu0 }
  0xee   :  { %v2410_v33 = vpop.f32.mrb[2].mxu1  ;;  %v106_v35 = vrot.slane %v93_v32, 7 }
  0xef   :  { %v163_v36 = vpop.f32.mrb[3].mxu1  ;;  %v113_v38 = vsel %vm109_vm3, %v108_v31, %v105_v27  ;;  %v110_v39 = vsel %vm109_vm3, %v107_v30, %v108_v31 }
  0xf0   :  { %v111_v40 = vsel %vm109_vm3, %v106_v35, %v107_v30  ;;  %v118_v41 = vsel %vm114_vm4, %v113_v38, 0.0  ;;  %v178_v42 = vadd.f32 %v2410_v33, %v110_v39  ;;  %v112_v43 = vsel %vm109_vm3, %v105_v27, %v106_v35 }
  0xf1   :  { %v120_v44 = vsel %vm116_vm5, %v111_v40, 0.0  ;;  %v175_v45 = vadd.f32 %v160_v29, %v118_v41  ;;  %v176_v46 = vadd.f32 %v163_v36, %v112_v43  ;;  %vm563_vm4 = vcmask 392192  }
  0xf2   :  { %v177_v48 = vadd.f32 %v2409_v26, %v120_v44  ;;  %v2415_v51 = vpop.f32.mrb[4].mxu0 }
  0xf3   :  { %v217_v53 = vpop.f32.mrb[5].mxu0  ;;  %v234_v56 = vrot.slane %v2415_v51, 1 }
  0xf4   :  { %v232_v54 = vrot.slane %v217_v53, 1  ;;  %v2416_v55 = vpop.f32.mrb[6].mxu0 }
  0xf5   :  { %v235_v57 = vrot.slane %v2416_v55, 1  ;;  %v220_v58 = vpop.f32.mrb[7].mxu0 }
  0xf6   :  { %v233_v60 = vrot.slane %v220_v58, 1 }
  0xf7   :  { %v237_v61 = vsel %vm236_vm6, %v234_v56, %v235_v57  ;;  %v240_v62 = vsel %vm236_vm6, %v235_v57, %v232_v54 }
  0xf8   :  { %v248_v0 = vsel %vm244_vm7, %v240_v62, 0.0  ;;  %v251_v1 = vadd.f32 %v237_v61, %v177_v48  ;;  %v238_v2 = vsel %vm236_vm6, %v233_v60, %v234_v56  ;;  %v239_v3 = vsel %vm236_vm6, %v232_v54, %v233_v60 }
  0xf9   :  { %v252_v4 = vadd.f32 %v248_v0, %v178_v42  ;;  %v246_v5 = vsel %vm242_vm8, %v238_v2, 0.0  ;;  %v249_v6 = vadd.f32 %v239_v3, %v175_v45 }
  0xfa   :  { %v260_v8 = vadd.f32 %v2273_v63, %v251_v1  ;;  %v250_v9 = vadd.f32 %v246_v5, %v176_v46 }
  0xfb   :  { %v261_v10 = vadd.f32 %v2273_v63, %v252_v4  ;;  %v258_v11 = vadd.f32 %v2273_v63, %v249_v6 }
  0xfc   :  { %v264_v12 = vmax.f32 %v260_v8, 0.0  ;;  %v259_v14 = vadd.f32 %v2273_v63, %v250_v9 }
  0xfd   :  { %v265_v15 = vmax.f32 %v261_v10, 0.0  ;;  %v2831_v16 = vmax.f32 %v258_v11, 0.0 }
  0xfe   :  { %v304_v17 = vcombine.high %v264_v12, %v264_v12  ;;  %v311_v18 = vrot.slane %v264_v12, %v2829_v7  ;;  %v2835_v22 = vmax.f32 %v259_v14, 0.0 }
  0xff   :  { %v321_v19 = vcombine.high %v265_v15, %v265_v15  ;;  %v328_v21 = vrot.slane %v265_v15, %v2829_v7  ;;  %v270_v26 = vcombine.high %v2831_v16, %v2831_v16  ;;  %v277_v3 = vrot.slane %v2831_v16, %v2829_v7 }
 0x100   :  { %v318_v23 = vrot.slane %v304_v17, %v2829_v7  ;;  %v319_v24 = vcombine.high %v311_v18, %v311_v18  ;;  %v411_v25 = vsel %vm354_vm9, %v311_v18, -inf  ;;  %v287_v16 = vcombine.high %v2835_v22, %v2835_v22 }
 0x101   :  { %v335_v27 = vrot.slane %v321_v19, %v2829_v7  ;;  %v336_v28 = vcombine.high %v328_v21, %v328_v21  ;;  %v412_v29 = vrot.slane %v411_v25, 4  ;;  %v439_v30 = vsel %vm354_vm9, %v328_v21, -inf }
 0x102   :  { %v320_v31 = vcombine.high %v318_v23, %v318_v23  ;;  %v418_v32 = vsel %vm354_vm9, %v319_v24, -inf  ;;  %v425_v33 = vsel %vm354_vm9, %v318_v23, -inf  ;;  %v440_v34 = vrot.slane %v439_v30, 4 }
 0x103   :  { %v337_v35 = vcombine.high %v335_v27, %v335_v27  ;;  %v413_v36 = vmax.f32 %v411_v25, %v412_v29  ;;  %v419_v38 = vrot.slane %v418_v32, 4  ;;  %v426_v39 = vrot.slane %v425_v33, 4 }
 0x104   :  { %v432_v40 = vsel %vm354_vm9, %v320_v31, -inf  ;;  %v441_v41 = vmax.f32 %v439_v30, %v440_v34  ;;  %v446_v42 = vsel %vm354_vm9, %v336_v28, -inf  ;;  %v453_v43 = vsel %vm354_vm9, %v335_v27, -inf }
 0x105   :  { %v414_v44 = vrot.slane %v413_v36, 2  ;;  %v420_v45 = vmax.f32 %v418_v32, %v419_v38  ;;  %v427_v46 = vmax.f32 %v425_v33, %v426_v39  ;;  %v433_v47 = vrot.slane %v432_v40, 4 }
 0x106   :  { %v442_v48 = vrot.slane %v441_v41, 2  ;;  %v447_v49 = vrot.slane %v446_v42, 4  ;;  %v454_v50 = vrot.slane %v453_v43, 4  ;;  %v460_v51 = vsel %vm354_vm9, %v337_v35, -inf }
 0x107   :  { %v415_v52 = vmax.f32 %v413_v36, %v414_v44  ;;  %v421_v53 = vrot.slane %v420_v45, 2  ;;  %v428_v54 = vrot.slane %v427_v46, 2  ;;  %v434_v55 = vmax.f32 %v432_v40, %v433_v47 }
 0x108   :  { %v443_v56 = vmax.f32 %v441_v41, %v442_v48  ;;  %v448_v57 = vmax.f32 %v446_v42, %v447_v49  ;;  %v455_v58 = vmax.f32 %v453_v43, %v454_v50  ;;  %v461_v59 = vrot.slane %v460_v51, 4 }
 0x109   :  { %v416_v60 = vrot.slane %v415_v52, 1  ;;  %v422_v61 = vmax.f32 %v420_v45, %v421_v53  ;;  %v429_v62 = vmax.f32 %v427_v46, %v428_v54  ;;  %v435_v63 = vrot.slane %v434_v55, 2 }
 0x10a   :  { %v444_v0 = vrot.slane %v443_v56, 1  ;;  %v449_v1 = vrot.slane %v448_v57, 2  ;;  %v456_v2 = vrot.slane %v455_v58, 2  ;;  %v2853_v12 = vmax.f32 %v460_v51, %v461_v59 }
 0x10b   :  { %v417_v4 = vmax.f32 %v415_v52, %v416_v60  ;;  %v423_v5 = vrot.slane %v422_v61, 1  ;;  %v430_v6 = vrot.slane %v429_v62, 1  ;;  %v436_v8 = vmax.f32 %v434_v55, %v435_v63 }
 0x10c   :  { %v2851_v9 = vmax.f32 %v443_v56, %v444_v0  ;;  %v450_v10 = vmax.f32 %v448_v57, %v449_v1  ;;  %v457_v11 = vmax.f32 %v455_v58, %v456_v2  ;;  %v284_v23 = vrot.slane %v270_v26, %v2829_v7 }
 0x10d   :  { %v424_v14 = vmax.f32 %v422_v61, %v423_v5  ;;  %v431_v15 = vmax.f32 %v429_v62, %v430_v6  ;;  %v437_v17 = vrot.slane %v436_v8, 1  ;;  %v475_v18 = vpack.c.bf16 %v417_v4, %v417_v4 }
 0x10e   :  { %v451_v19 = vrot.slane %v450_v10, 1  ;;  %v458_v21 = vrot.slane %v457_v11, 1  ;;  %v463_v29 = vrot.slane %v2853_v12, 2  ;;  %v479_v30 = vpack.c.bf16 %v2851_v9, %v2851_v9 }
 0x10f   :  { %v2858_v24 = vmax.f32 %v436_v8, %v437_v17  ;;  %v476_v25 = vpack.c.bf16 %v424_v14, %v424_v14  ;;  %v477_v27 = vpack.c.bf16 %v431_v15, %v431_v15  ;;  %v285_v31 = vcombine.high %v277_v3, %v277_v3 }
 0x110   :  { %v2860_v28 = vmax.f32 %v450_v10, %v451_v19  ;;  %v2865_v32 = vmax.f32 %v457_v11, %v458_v21  ;;  %v515_v33 = vunpack.c.l.b16 %v475_v18  ;;  %v286_v34 = vcombine.high %v284_v23, %v284_v23 }
 0x111   :  { %v516_v26 = vunpack.c.l.b16 %v476_v25  ;;  %v478_v35 = vpack.c.bf16 %v2858_v24, %v2858_v24  ;;  %v294_v36 = vrot.slane %v2835_v22, %v2829_v7  ;;  %v301_v38 = vrot.slane %v287_v16, %v2829_v7 }
 0x112   :  { %v355_v39 = vsel %vm354_vm9, %v277_v3, -inf  ;;  %v480_v40 = vpack.c.bf16 %v2860_v28, %v2860_v28  ;;  %v2875_v41 = vunpack.c.l.b16 %v477_v27  ;;  %v362_v43 = vsel %vm354_vm9, %v285_v31, -inf }
 0x113   :  { %v356_v42 = vrot.slane %v355_v39, 4  ;;  %v2879_v44 = vsel %vm523_vm10, %v516_v26, %v515_v33  ;;  %v302_v45 = vcombine.high %v294_v36, %v294_v36  ;;  %v303_v46 = vcombine.high %v301_v38, %v301_v38 }
 0x114   :  { %v363_v47 = vrot.slane %v362_v43, 4  ;;  %v369_v22 = vsel %vm354_vm9, %v284_v23, -inf  ;;  %v376_v49 = vsel %vm354_vm9, %v286_v34, -inf  ;;  %v383_v50 = vsel %vm354_vm9, %v294_v36, -inf }
 0x115   :  { %v357_v48 = vmax.f32 %v355_v39, %v356_v42  ;;  %v370_v52 = vrot.slane %v369_v22, 4  ;;  %v377_v53 = vrot.slane %v376_v49, 4  ;;  %v384_v54 = vrot.slane %v383_v50, 4 }
 0x116   :  { %v364_v51 = vmax.f32 %v362_v43, %v363_v47  ;;  %v390_v56 = vsel %vm354_vm9, %v302_v45, -inf  ;;  %v397_v57 = vsel %vm354_vm9, %v301_v38, -inf  ;;  %v404_v58 = vsel %vm354_vm9, %v303_v46, -inf }
 0x117   :  { %v358_v55 = vrot.slane %v357_v48, 2  ;;  %v371_v60 = vmax.f32 %v369_v22, %v370_v52  ;;  %v378_v61 = vmax.f32 %v376_v49, %v377_v53  ;;  %v385_v62 = vmax.f32 %v383_v50, %v384_v54 }
 0x118   :  { %v365_v59 = vrot.slane %v364_v51, 2  ;;  %v391_v0 = vrot.slane %v390_v56, 4  ;;  %v398_v1 = vrot.slane %v397_v57, 4  ;;  %v405_v2 = vrot.slane %v404_v58, 4 }
 0x119   :  { %v359_v63 = vmax.f32 %v357_v48, %v358_v55  ;;  %v372_v4 = vrot.slane %v371_v60, 2  ;;  %v379_v5 = vrot.slane %v378_v61, 2  ;;  %v386_v6 = vrot.slane %v385_v62, 2 }
 0x11a   :  { %v366_v3 = vmax.f32 %v364_v51, %v365_v59  ;;  %v392_v10 = vmax.f32 %v390_v56, %v391_v0  ;;  %v399_v11 = vmax.f32 %v397_v57, %v398_v1  ;;  %v406_v14 = vmax.f32 %v404_v58, %v405_v2 }
 0x11b   :  { %v360_v8 = vrot.slane %v359_v63, 1  ;;  %v373_v17 = vmax.f32 %v371_v60, %v372_v4  ;;  %v380_v18 = vmax.f32 %v378_v61, %v379_v5  ;;  %v387_v19 = vmax.f32 %v385_v62, %v386_v6 }
 0x11c   :  { %v367_v15 = vrot.slane %v366_v3, 1  ;;  %v393_v23 = vrot.slane %v392_v10, 2  ;;  %v400_v16 = vrot.slane %v399_v11, 2  ;;  %v407_v25 = vrot.slane %v406_v14, 2 }
 0x11d   :  { %v361_v21 = vmax.f32 %v359_v63, %v360_v8  ;;  %v374_v31 = vrot.slane %v373_v17, 1  ;;  %v381_v33 = vrot.slane %v380_v18, 1  ;;  %v388_v26 = vrot.slane %v387_v19, 1 }
 0x11e   :  { %v368_v27 = vmax.f32 %v366_v3, %v367_v15  ;;  %v394_v34 = vmax.f32 %v392_v10, %v393_v23  ;;  %v401_v36 = vmax.f32 %v399_v11, %v400_v16  ;;  %v408_v39 = vmax.f32 %v406_v14, %v407_v25  ;;  %v2577_v23 = vld [vmem:[#allocation2 + $0x44] sm:$0xff]   ;;  %v2578_v16 = vld [vmem:[#allocation2 + $0x4c] sm:$0xff]   ;;  %v2579_v25 = vld [vmem:[#allocation2 + $0x54] sm:$0xff]  }
 0x11f   :  { %v467_v38 = vpack.c.bf16 %v361_v21, %v361_v21  ;;  %v375_v42 = vmax.f32 %v373_v17, %v374_v31  ;;  %v382_v43 = vmax.f32 %v380_v18, %v381_v33  ;;  %v389_v45 = vmax.f32 %v387_v19, %v388_v26  ;;  %v2576_v19 = vld [vmem:[#allocation2 + $0x3c] sm:$0xff]   ;;  %v2582_v33 = vld [vmem:[#allocation2 + $0x6c] sm:$0xff]  }
 0x120   :  { %v468_v46 = vpack.c.bf16 %v368_v27, %v368_v27  ;;  %v395_v47 = vrot.slane %v394_v34, 1  ;;  %v402_v48 = vrot.slane %v401_v36, 1  ;;  %v409_v49 = vrot.slane %v408_v39, 1  ;;  %v2580_v27 = vld [vmem:[#allocation2 + $0x64] sm:$0xff]   ;;  %v2581_v31 = vld [vmem:[#allocation2 + $0x5c] sm:$0xff]  }
 0x121   :  { %v507_v22 = vunpack.c.l.b16 %v467_v38  ;;  %v469_v50 = vpack.c.bf16 %v375_v42, %v375_v42  ;;  %v470_v51 = vpack.c.bf16 %v382_v43, %v382_v43  ;;  %v471_v52 = vpack.c.bf16 %v389_v45, %v389_v45 }
 0x122   :  { %v508_v53 = vunpack.c.l.b16 %v468_v46  ;;  %v396_v54 = vmax.f32 %v394_v34, %v395_v47  ;;  %v403_v55 = vmax.f32 %v401_v36, %v402_v48  ;;  %v410_v56 = vmax.f32 %v408_v39, %v409_v49 }
 0x123   :  { %v464_v57 = vmax.f32 %v2853_v12, %v463_v29  ;;  %v518_v58 = vunpack.c.l.b16 %v478_v35  ;;  %v509_v59 = vunpack.c.l.b16 %v469_v50  ;;  %v510_v60 = vunpack.c.l.b16 %v470_v51 }
 0x124   :  { %v524_v61 = vsel %vm523_vm10, %v508_v53, %v507_v22  ;;  %v472_v62 = vpack.c.bf16 %v396_v54, %v396_v54  ;;  %v473_v0 = vpack.c.bf16 %v403_v55, %v403_v55  ;;  %v474_v1 = vpack.c.bf16 %v410_v56, %v410_v56 }
 0x125   :  { %v465_v63 = vrot.slane %v464_v57, 1  ;;  %v481_v2 = vpack.c.bf16 %v2865_v32, %v2865_v32  ;;  %v526_v3 = vsel %vm525_vm11, %v509_v59, %v524_v61  ;;  %v538_v12 = vsel %vm525_vm11, %v2875_v41, %v2879_v44 }
 0x126   :  { %v519_v24 = vunpack.c.l.b16 %v479_v30  ;;  %v520_v29 = vunpack.c.l.b16 %v480_v40  ;;  %v511_v35 = vunpack.c.l.b16 %v471_v52  ;;  %v512_v5 = vunpack.c.l.b16 %v472_v62 }
 0x127   :  { %v466_v4 = vmax.f32 %v464_v57, %v465_v63  ;;  %v513_v6 = vunpack.c.l.b16 %v473_v0  ;;  %v528_v32 = vsel %vm527_vm12, %v510_v60, %v526_v3  ;;  %v539_v8 = vsel %vm527_vm12, %v518_v58, %v538_v12  ;;  %v2286_v0 = vld [vmem:[%s3171_s2 + $0x1] ss:$0 sm:$0xff] }
 0x128   :  { %v521_v11 = vunpack.c.l.b16 %v481_v2  ;;  %v530_v41 = vsel %vm529_vm13, %v511_v35, %v528_v32  ;;  %v540_v44 = vsel %vm529_vm13, %v519_v24, %v539_v8  ;;  %v514_v9 = vunpack.c.l.b16 %v474_v1 }
 0x129   :  { %v482_v10 = vpack.c.bf16 %v466_v4, %v466_v4  ;;  %v532_v30 = vsel %vm531_vm14, %v512_v5, %v530_v41  ;;  %v541_v28 = vsel %vm531_vm14, %v520_v29, %v540_v44  ;;  %v483_v26 = vand.u32 7, %v2798_v20 }
 0x12a   :  { %v534_v14 = vsel %vm533_vm15, %v513_v6, %v532_v30  ;;  %v542_v15 = vsel %vm533_vm15, %v521_v11, %v541_v28  ;;  %v484_v34 = vand.u32 7, %v2805_v37 }
 0x12b   :  { %v522_v40 = vunpack.c.l.b16 %v482_v10  ;;  %v536_v17 = vsel %vm535_vm1, %v514_v9, %v534_v14  ;;  %vm612_vm5 = vcmp.ge.s32.totalorder %v483_v26, 1  ;;  %vm752_vm9 = vcmp.le.s32.totalorder %v483_v26, 6 }
 0x12c   :  { %vm613_vm7 = vcmp.ge.s32.totalorder %v484_v34, 1  ;;  %vm753_vm8 = vcmp.le.s32.totalorder %v484_v34, 6 }
 0x12d   :  { %v543_v18 = vsel %vm535_vm1, %v522_v40, %v542_v15 }
 0x12e   :  { %v544_v21 = vpack.c.b16 %v543_v18, %v536_v17 }
 0x130   :  { %2424 = vmatmul.mubr.msk.bf16.vlgmr.msra.gmra.mrb[4].mxu1 %vm563_vm4, %v544_v21  ;;  %2434 = vmatmul.mubr.msk.bf16.vlgmr.msra.gmra.mrb[8].mxu0 %vm563_vm4, %v544_v21 }
 0x131   :  { %2438 = vmatpush3.bf16.msra.mxu1 %v2576_v19  ;;  %2443 = vmatprep.mubr.msk.bf16.mxu1 %vm2724_vm2, %v2723_v13 }
 0x132   :  { %2439 = vmatprep.subr.bf16.mxu1 %v2723_v13  ;;  %2451 = vmatprep.mubr.msk.bf16.mxu0 %vm2724_vm2, %v2723_v13 }
 0x133   :  { %2448 = vmatpush3.bf16.msra.mxu0 %v2579_v25 }
 0x134   :  { %2449 = vmatprep.subr.bf16.mxu0 %v2723_v13 }
 0x135   :  { %2440 = vmatpush3.bf16.msra.mxu1 %v2577_v23 }
 0x136   :  { %2441 = vmatprep.subr.bf16.mxu1 %v2723_v13 }
 0x137   :  { %2450 = vmatpush3.bf16.msra.mxu0 %v2581_v31 }
 0x138   :  { %2463 = vmatprep.subr.bf16.mxu0 %v2723_v13 }
 0x139   :  { %2442 = vmatpush3.bf16.msra.mxu1 %v2578_v16 }
 0x13a   :  { %2455 = vmatprep.subr.bf16.mxu1 %v2723_v13 }
 0x13c   :  { %2444 = vmatmul.mubr.msk.bf16.vlgmr.msra.gmra.mrb[8].mxu1 %vm563_vm4, %v544_v21 }
 0x13d   :  { %2459 = vmatprep.mubr.msk.bf16.mxu1 %vm2724_vm2, %v2723_v13  ;;  %2456 = vmatpush3.bf16.msra.mxu1 %v2580_v27 }
 0x13e   :  { %2457 = vmatprep.subr.bf16.mxu1 %v2723_v13 }
 0x141   :  { %2458 = vmatpush3.bf16.msra.mxu1 %v2582_v33 }
 0x142   :  { %2471 = vmatprep.subr.bf16.mxu1 %v2723_v13 }
 0x203   :  { %v601_v36 = vpop.f32.mrb[4].mxu1  ;;  %v674_v38 = vpop.f32.mrb[8].mxu0 }
 0x204   :  { %v2425_v39 = vpop.f32.mrb[5].mxu1  ;;  %v2435_v42 = vpop.f32.mrb[9].mxu0  ;;  %v608_v46 = vrot.slane %v601_v36, 7 }
 0x205   :  { %v604_v43 = vpop.f32.mrb[6].mxu1  ;;  %v677_v45 = vpop.f32.mrb[10].mxu0 }
 0x206   :  { %v609_v47 = vrot.slane %v604_v43, 7  ;;  %v2426_v48 = vpop.f32.mrb[7].mxu1  ;;  %v2436_v22 = vpop.f32.mrb[11].mxu0 }
 0x208   :  { %v611_v49 = vsel %vm109_vm3, %v609_v47, %v608_v46  ;;  %v610_v50 = vsel %vm109_vm3, %v608_v46, %v609_v47  ;;  %vm811_vm3 = vcmask 254976  }
 0x209   :  { %v614_v51 = vsel %vm612_vm5, %v611_v49, 0.0  ;;  %v615_v37 = vsel %vm613_vm7, %v610_v50, 0.0 }
 0x20a   :  { %v681_v52 = vadd.f32 %v674_v38, %v614_v51  ;;  %v682_v53 = vadd.f32 %v677_v45, %v615_v37 }
 0x20f   :  { %v741_v54 = vpop.f32.mrb[8].mxu1 }
 0x210   :  { %v2445_v55 = vpop.f32.mrb[9].mxu1  ;;  %v748_v57 = vrot.slane %v741_v54, 1 }
 0x211   :  { %v744_v56 = vpop.f32.mrb[10].mxu1 }
 0x212   :  { %v749_v58 = vrot.slane %v744_v56, 1  ;;  %v2446_v59 = vpop.f32.mrb[11].mxu1 }
 0x214   :  { %v750_v60 = vsel %vm236_vm6, %v748_v57, %v749_v58  ;;  %v751_v61 = vsel %vm236_vm6, %v749_v58, %v748_v57  ;;  %vm917_vm6 = vcmask 261120  }
 0x215   :  { %v754_v62 = vsel %vm752_vm9, %v750_v60, 0.0  ;;  %v755_v63 = vsel %vm753_vm8, %v751_v61, 0.0 }
 0x216   :  { %v756_v1 = vadd.f32 %v754_v62, %v681_v52  ;;  %v757_v2 = vadd.f32 %v755_v63, %v682_v53 }
 0x218   :  { %v763_v3 = vadd.f32 %v2286_v0, %v756_v1  ;;  %v764_v12 = vadd.f32 %v2286_v0, %v757_v2 }
 0x21a   :  { %v765_v24 = vmax.f32 %v763_v3, 0.0  ;;  %v766_v29 = vmax.f32 %v764_v12, 0.0 }
 0x21c   :  { %v769_v35 = vcombine.high %v765_v24, %v765_v24  ;;  %v776_v4 = vrot.slane %v765_v24, %v2829_v7  ;;  %v786_v5 = vcombine.high %v766_v29, %v766_v29  ;;  %v793_v6 = vrot.slane %v766_v29, %v2829_v7 }
 0x21e   :  { %v783_v32 = vrot.slane %v769_v35, %v2829_v7  ;;  %v784_v8 = vcombine.high %v776_v4, %v776_v4  ;;  %v800_v10 = vrot.slane %v786_v5, %v2829_v7  ;;  %v801_v11 = vcombine.high %v793_v6, %v793_v6 }
 0x21f   :  { %v812_v41 = vsel %vm811_vm3, %v776_v4, -inf  ;;  %v840_v44 = vsel %vm811_vm3, %v793_v6, -inf }
 0x220   :  { %v785_v9 = vcombine.high %v783_v32, %v783_v32  ;;  %v802_v30 = vcombine.high %v800_v10, %v800_v10  ;;  %v813_v28 = vrot.slane %v812_v41, 4  ;;  %v819_v40 = vsel %vm811_vm3, %v784_v8, -inf }
 0x221   :  { %v820_v14 = vrot.slane %v819_v40, 4  ;;  %v826_v15 = vsel %vm811_vm3, %v783_v32, -inf  ;;  %v841_v17 = vrot.slane %v840_v44, 4  ;;  %v847_v18 = vsel %vm811_vm3, %v801_v11, -inf }
 0x222   :  { %v814_v19 = vmax.f32 %v812_v41, %v813_v28  ;;  %v827_v21 = vrot.slane %v826_v15, 4  ;;  %v833_v23 = vsel %vm811_vm3, %v785_v9, -inf  ;;  %v848_v16 = vrot.slane %v847_v18, 4 }
 0x223   :  { %v821_v25 = vmax.f32 %v819_v40, %v820_v14  ;;  %v834_v27 = vrot.slane %v833_v23, 4  ;;  %v842_v31 = vmax.f32 %v840_v44, %v841_v17  ;;  %v854_v33 = vsel %vm811_vm3, %v800_v10, -inf }
 0x224   :  { %v815_v26 = vrot.slane %v814_v19, 2  ;;  %v828_v34 = vmax.f32 %v826_v15, %v827_v21  ;;  %v849_v36 = vmax.f32 %v847_v18, %v848_v16  ;;  %v855_v38 = vrot.slane %v854_v33, 4 }
 0x225   :  { %v822_v39 = vrot.slane %v821_v25, 2  ;;  %v835_v42 = vmax.f32 %v833_v23, %v834_v27  ;;  %v843_v43 = vrot.slane %v842_v31, 2  ;;  %v861_v45 = vsel %vm811_vm3, %v802_v30, -inf }
 0x226   :  { %v816_v46 = vmax.f32 %v814_v19, %v815_v26  ;;  %v829_v47 = vrot.slane %v828_v34, 2  ;;  %v850_v48 = vrot.slane %v849_v36, 2  ;;  %v856_v22 = vmax.f32 %v854_v33, %v855_v38 }
 0x227   :  { %v823_v49 = vmax.f32 %v821_v25, %v822_v39  ;;  %v836_v50 = vrot.slane %v835_v42, 2  ;;  %v844_v51 = vmax.f32 %v842_v31, %v843_v43  ;;  %v862_v37 = vrot.slane %v861_v45, 4  ;;  %v2584_v39 = vld [vmem:[#allocation2 + $0x7c] sm:$0xff]   ;;  %v2969_v43 = vld [vmem:[#allocation2 + $0x8c] sm:$0xff]  }
 0x228   :  { %v817_v52 = vrot.slane %v816_v46, 1  ;;  %v830_v53 = vmax.f32 %v828_v34, %v829_v47  ;;  %v851_v54 = vmax.f32 %v849_v36, %v850_v48  ;;  %v857_v55 = vrot.slane %v856_v22, 2  ;;  %v2583_v36 = vld [vmem:[#allocation2 + $0x74] sm:$0xff]  }
 0x229   :  { %v824_v56 = vrot.slane %v823_v49, 1  ;;  %v837_v57 = vmax.f32 %v835_v42, %v836_v50  ;;  %v845_v58 = vrot.slane %v844_v51, 1  ;;  %v863_v59 = vmax.f32 %v861_v45, %v862_v37  ;;  %v2585_v42 = vld [vmem:[#allocation2 + $0x84] sm:$0xff]   ;;  %v2587_v45 = vld [vmem:[#allocation2 + $0x94] ss:$0 sps:$4 sm:$0x33]  }
 0x22a   :  { %v818_v60 = vmax.f32 %v816_v46, %v817_v52  ;;  %v831_v61 = vrot.slane %v830_v53, 1  ;;  %v852_v62 = vrot.slane %v851_v54, 1  ;;  %v858_v63 = vmax.f32 %v856_v22, %v857_v55 }
 0x22b   :  { %v825_v0 = vmax.f32 %v823_v49, %v824_v56  ;;  %v838_v1 = vrot.slane %v837_v57, 1  ;;  %v846_v2 = vmax.f32 %v844_v51, %v845_v58  ;;  %v864_v3 = vrot.slane %v863_v59, 2 }
 0x22c   :  { %v832_v12 = vmax.f32 %v830_v53, %v831_v61  ;;  %v853_v24 = vmax.f32 %v851_v54, %v852_v62  ;;  %v859_v29 = vrot.slane %v858_v63, 1  ;;  %v868_v35 = vpack.c.bf16 %v818_v60, %v818_v60 }
 0x22d   :  { %v839_v4 = vmax.f32 %v837_v57, %v838_v1  ;;  %v869_v5 = vpack.c.bf16 %v825_v0, %v825_v0  ;;  %v865_v6 = vmax.f32 %v863_v59, %v864_v3  ;;  %v872_v8 = vpack.c.bf16 %v846_v2, %v846_v2 }
 0x22e   :  { %v870_v32 = vpack.c.bf16 %v832_v12, %v832_v12  ;;  %v873_v10 = vpack.c.bf16 %v853_v24, %v853_v24  ;;  %v860_v11 = vmax.f32 %v858_v63, %v859_v29  ;;  %v889_v44 = vunpack.c.l.b16 %v868_v35 }
 0x22f   :  { %v871_v41 = vpack.c.bf16 %v839_v4, %v839_v4  ;;  %v890_v9 = vunpack.c.l.b16 %v869_v5  ;;  %v866_v30 = vrot.slane %v865_v6, 1  ;;  %v893_v18 = vunpack.c.l.b16 %v872_v8 }
 0x230   :  { %v891_v28 = vunpack.c.l.b16 %v870_v32  ;;  %v874_v40 = vpack.c.bf16 %v860_v11, %v860_v11  ;;  %v894_v23 = vunpack.c.l.b16 %v873_v10  ;;  %v2974_v46 = vsel %vm52_vm0, %v2587_v45, 0 }
 0x231   :  { %v892_v14 = vunpack.c.l.b16 %v871_v41  ;;  %v897_v15 = vsel %vm523_vm10, %v890_v9, %v889_v44  ;;  %v867_v17 = vmax.f32 %v865_v6, %v866_v30  ;;  %v2726_v47 = vmov 0  }
 0x232   :  { %v898_v19 = vsel %vm525_vm11, %v891_v28, %v897_v15  ;;  %v895_v25 = vunpack.c.l.b16 %v874_v40  ;;  %v876_v48 = vand.u32 3, %v2798_v20  ;;  %v2296_v20 = vld [vmem:[%s3171_s2 + $0x2] ss:$0 sm:$0xff] }
 0x233   :  { %v875_v21 = vpack.c.bf16 %v867_v17, %v867_v17  ;;  %v899_v16 = vsel %vm527_vm12, %v892_v14, %v898_v19 }
 0x234   :  { %v900_v27 = vsel %vm529_vm13, %v893_v18, %v899_v16  ;;  %vm962_vm13 = vcmp.ge.s32.totalorder %v876_v48, 1 }
 0x235   :  { %v896_v31 = vunpack.c.l.b16 %v875_v21  ;;  %v901_v33 = vsel %vm531_vm14, %v894_v23, %v900_v27  ;;  %vm1078_vm14 = vcmp.le.s32.totalorder %v876_v48, 2 }
 0x236   :  { %v902_v26 = vsel %vm533_vm15, %v895_v25, %v901_v33  ;;  %vm1110_vm15 = vcmask 123904  }
 0x237   :  { %v903_v34 = vsel %vm535_vm1, %v896_v31, %v902_v26  ;;  %vm1171_vm1 = vcmask 130048  }
 0x238   :  { %v904_v38 = vpack.c.b16 %v903_v34, %v903_v34 }
 0x23a   :  { %2452 = vmatmul.mubr.msk.bf16.vlgmr.msra.gmra.mrb[12].mxu0 %vm917_vm6, %v904_v38  ;;  %2460 = vmatmul.mubr.msk.bf16.vlgmr.msra.gmra.mrb[12].mxu1 %vm917_vm6, %v904_v38 }
 0x23b   :  { %2464 = vmatpush3.bf16.msra.mxu0 %v2583_v36  ;;  %2467 = vmatprep.mubr.msk.bf16.mxu0 %vm2724_vm2, %v2723_v13 }
 0x23c   :  { %2465 = vmatprep.subr.bf16.mxu0 %v2723_v13  ;;  %2473 = vmatprep.mubr.msk.bf16.mxu1 %vm2724_vm2, %v2723_v13 }
 0x23d   :  { %2472 = vmatpush3.bf16.msra.mxu1 %v2585_v42 }
 0x23e   :  { %2485 = vmatprep.subr.bf16.mxu1 %v2723_v13 }
 0x23f   :  { %2466 = vmatpush3.bf16.msra.mxu0 %v2584_v39 }
 0x240   :  { %2477 = vmatprep.subr.bf16.mxu0 %v2723_v13 }
 0x242   :  { %2468 = vmatmul.mubr.msk.bf16.vlgmr.msra.gmra.mrb[16].mxu0 %vm917_vm6, %v904_v38 }
 0x243   :  { %2481 = vmatprep.mubr.msk.bf16.mxu0 %vm2724_vm2, %v2723_v13  ;;  %2478 = vmatpush3.bf16.msra.mxu0 %v2969_v43 }
 0x244   :  { %2479 = vmatprep.subr.bf16.mxu0 %v2723_v13 }
 0x247   :  { %2480 = vmatpush3.bf16.msra.mxu0 %v2974_v46 }
 0x248   :  { %2493 = vmatprep.subr.bf16.mxu0 %v2723_v13 }
 0x24a   :  { %2482 = vmatmul.mubr.bf16.vlgmr.msra.gmra.mrb[20].mxu0 %v2726_v47 }
 0x24b   :  { %2497 = vmatprep.mubr.msk.bf16.mxu0 %vm2724_vm2, %v2723_v13 }
 0x30d   :  { %v955_v22 = vpop.f32.mrb[12].mxu0  ;;  %v1014_v49 = vpop.f32.mrb[12].mxu1 }
 0x30e   :  { %v961_v50 = vrot.slane %v955_v22, 7  ;;  %v2453_v51 = vpop.f32.mrb[13].mxu0  ;;  %v2461_v37 = vpop.f32.mrb[13].mxu1 }
 0x30f   :  { %v958_v52 = vpop.f32.mrb[14].mxu0  ;;  %v1017_v53 = vpop.f32.mrb[14].mxu1 }
 0x310   :  { %v963_v54 = vsel %vm962_vm13, %v961_v50, 0.0  ;;  %v2454_v55 = vpop.f32.mrb[15].mxu0  ;;  %v2462_v56 = vpop.f32.mrb[15].mxu1 }
 0x311   :  { %v1020_v57 = vadd.f32 %v1014_v49, %v963_v54 }
 0x315   :  { %v1071_v58 = vpop.f32.mrb[16].mxu0 }
 0x316   :  { %v1077_v59 = vrot.slane %v1071_v58, 1  ;;  %v2469_v60 = vpop.f32.mrb[17].mxu0  ;;  %v2297_v58 = vld [vmem:[%s3171_s2 + $0x3] ss:$0 sm:$0xff] }
 0x317   :  { %v1074_v61 = vpop.f32.mrb[18].mxu0 }
 0x318   :  { %v1079_v62 = vsel %vm1078_vm14, %v1077_v59, 0.0  ;;  %v2470_v63 = vpop.f32.mrb[19].mxu0 }
 0x319   :  { %v1080_v0 = vadd.f32 %v1079_v62, %v1020_v57 }
 0x31b   :  { %v1086_v1 = vadd.f32 %v2296_v20, %v1080_v0 }
 0x31d   :  { %v1087_v2 = vmax.f32 %v1086_v1, 0.0  ;;  %v1276_v54 = vpop.f32.mrb[20].mxu0 }
 0x31e   :  { %v2483_v55 = vpop.f32.mrb[21].mxu0  ;;  %v1289_v59 = vrot.slane %v1276_v54, %v2829_v7 }
 0x31f   :  { %v1089_v3 = vcombine.high %v1087_v2, %v1087_v2  ;;  %v1096_v12 = vrot.slane %v1087_v2, %v2829_v7  ;;  %v1279_v56 = vpop.f32.mrb[22].mxu0 }
 0x320   :  { %v2484_v57 = vpop.f32.mrb[23].mxu0 }
 0x321   :  { %v1103_v24 = vrot.slane %v1089_v3, %v2829_v7  ;;  %v1104_v29 = vcombine.high %v1096_v12, %v1096_v12  ;;  %v1111_v35 = vsel %vm1110_vm15, %v1096_v12, -inf }
 0x322   :  { %v1112_v4 = vrot.slane %v1111_v35, 4 }
 0x323   :  { %v1105_v5 = vcombine.high %v1103_v24, %v1103_v24  ;;  %v1118_v6 = vsel %vm1110_vm15, %v1104_v29, -inf  ;;  %v1125_v32 = vsel %vm1110_vm15, %v1103_v24, -inf }
 0x324   :  { %v1113_v8 = vmax.f32 %v1111_v35, %v1112_v4  ;;  %v1119_v10 = vrot.slane %v1118_v6, 4  ;;  %v1126_v11 = vrot.slane %v1125_v32, 4 }
 0x325   :  { %v1132_v41 = vsel %vm1110_vm15, %v1105_v5, -inf }
 0x326   :  { %v1114_v44 = vrot.slane %v1113_v8, 2  ;;  %v1120_v9 = vmax.f32 %v1118_v6, %v1119_v10  ;;  %v1127_v30 = vmax.f32 %v1125_v32, %v1126_v11  ;;  %v1133_v28 = vrot.slane %v1132_v41, 4 }
 0x328   :  { %v1115_v40 = vmax.f32 %v1113_v8, %v1114_v44  ;;  %v1121_v14 = vrot.slane %v1120_v9, 2  ;;  %v1128_v15 = vrot.slane %v1127_v30, 2  ;;  %v1134_v17 = vmax.f32 %v1132_v41, %v1133_v28 }
 0x32a   :  { %v1116_v18 = vrot.slane %v1115_v40, 1  ;;  %v1122_v19 = vmax.f32 %v1120_v9, %v1121_v14  ;;  %v1129_v21 = vmax.f32 %v1127_v30, %v1128_v15  ;;  %v1135_v23 = vrot.slane %v1134_v17, 2 }
 0x32c   :  { %v1117_v16 = vmax.f32 %v1115_v40, %v1116_v18  ;;  %v1123_v25 = vrot.slane %v1122_v19, 1  ;;  %v1130_v27 = vrot.slane %v1129_v21, 1  ;;  %v1136_v31 = vmax.f32 %v1134_v17, %v1135_v23 }
 0x32e   :  { %v1124_v33 = vmax.f32 %v1122_v19, %v1123_v25  ;;  %v1131_v26 = vmax.f32 %v1129_v21, %v1130_v27  ;;  %v1137_v34 = vrot.slane %v1136_v31, 1  ;;  %v1145_v36 = vpack.c.bf16 %v1117_v16, %v1117_v16 }
 0x330   :  { %v1146_v38 = vpack.c.bf16 %v1124_v33, %v1124_v33  ;;  %v1147_v39 = vpack.c.bf16 %v1131_v26, %v1131_v26  ;;  %v1138_v42 = vmax.f32 %v1136_v31, %v1137_v34  ;;  %v1157_v45 = vunpack.c.l.b16 %v1145_v36 }
 0x332   :  { %v1158_v48 = vunpack.c.l.b16 %v1146_v38  ;;  %v1159_v22 = vunpack.c.l.b16 %v1147_v39  ;;  %v1148_v49 = vpack.c.bf16 %v1138_v42, %v1138_v42 }
 0x334   :  { %v1160_v50 = vunpack.c.l.b16 %v1148_v49  ;;  %v1161_v51 = vsel %vm523_vm10, %v1158_v48, %v1157_v45 }
 0x335   :  { %v1162_v37 = vsel %vm525_vm11, %v1159_v22, %v1161_v51  ;;  %vm1235_vm11 = vcmask 162816  }
 0x336   :  { %v1163_v52 = vsel %vm527_vm12, %v1160_v50, %v1162_v37  ;;  %vm1464_vm12 = vcmask 1040384  }
 0x337   :  { %v1164_v53 = vpack.c.b16 %v1163_v52, %v1163_v52 }
 0x339   :  { %2474 = vmatmul.mubr.msk.bf16.vlgmr.msra.gmra.mrb[16].mxu1 %vm1171_vm1, %v1164_v53 }
 0x33a   :  { %2486 = vmatpush3.bf16.msra.mxu1 %v2969_v43  ;;  %2489 = vmatprep.mubr.msk.bf16.mxu1 %vm2724_vm2, %v2723_v13 }
 0x33b   :  { %2487 = vmatprep.subr.bf16.mxu1 %v2723_v13 }
 0x33e   :  { %2488 = vmatpush3.bf16.msra.mxu1 %v2974_v46  ;;  %v1290_v46 = vrot.slane %v1289_v59, 1 }
 0x33f   :  { %2501 = vmatprep.subr.bf16.mxu1 %v2723_v13 }
 0x40c   :  { %v1209_v43 = vpop.f32.mrb[16].mxu1 }
 0x40d   :  { %v1210_v60 = vadd.f32 %v2297_v58, %v1209_v43  ;;  %v2475_v61 = vpop.f32.mrb[17].mxu1 }
 0x40e   :  { %v1212_v62 = vpop.f32.mrb[18].mxu1 }
 0x40f   :  { %v3002_v20 = vrot.slane %v1210_v60, %v2829_v7  ;;  %v2476_v63 = vpop.f32.mrb[19].mxu1 }
 0x411   :  { %v3006_v0 = vcombine.high %v3002_v20, %v3002_v20  ;;  %v1293_v2 = vadd.f32 %v1289_v59, %v3002_v20 }
 0x413   :  { %v1294_v1 = vadd.f32 %v1290_v46, %v3006_v0  ;;  %v2302_v29 = vmul.f32 -1.442695, %v1293_v2 }
 0x415   :  { %2600 = vtanh.f32 %v1294_v1  ;;  %v2303_v24 = vmul.f32 -1.442695, %v1294_v1 }
 0x416   :  { %2602 = vtanh.f32 %v1293_v2 }
 0x417   :  { %2604 = vpow2.f32 %v2303_v24 }
 0x418   :  { %2606 = vpow2.f32 %v2302_v29 }
 0x41f   :  { %v2601_v3 = vpop.eup %2600 }
 0x420   :  { %1315 = vrot.lane.b32.xlu0 %v2601_v3, %s2727_s13  ;;  %v2603_v12 = vpop.eup %2602 }
 0x421   :  { %v2605_v35 = vpop.eup %2604 }
 0x422   :  { %v1302_v4 = vadd.f32 1.0, %v2605_v35  ;;  %v2607_v5 = vpop.eup %2606  ;;  %v2588_v35 = vld [vmem:[#allocation2 + $0x98] sm:$0xff]  }
 0x423   :  { %v1301_v6 = vadd.f32 1.0, %v2607_v5  ;;  %v2590_v5 = vld [vmem:[#allocation2 + $0xa0] ss:$0 sps:$4 sm:$0x33]   ;;  %2494 = vmatpush3.bf16.msra.mxu0 %v2588_v35 }
 0x424   :  { %1313 = vrot.lane.b32.xlu0 %v2603_v12, %s2727_s13  ;;  %2608 = vrcp.f32 %v1302_v4  ;;  %v2589_v4 = vld [vmem:[#allocation2 + $0xa4] sm:$0xff]   ;;  %2495 = vmatprep.subr.bf16.mxu0 %v2723_v13 }
 0x425   :  { %2610 = vrcp.f32 %v1301_v6  ;;  %v2591_v6 = vld [vmem:[#allocation2 + $0xac] ss:$0 sps:$4 sm:$0x33]  }
 0x42e   :  { %v2609_v32 = vpop.eup %2608 }
 0x42f   :  { %v2611_v11 = vpop.eup %2610  ;;  %v1310_v9 = vmul.f32 0.0, %v2609_v32 }
 0x430   :  { %v1309_v40 = vmul.f32 0.0, %v2611_v11 }
 0x492   :  { %v1316_v8 = vpop.permute.xlu0 %1315 }
 0x493   :  { %v1320_v10 = vmul.f32 %v2609_v32, %v1316_v8  ;;  %v1506_v8 = vsel %vm52_vm0, %v2590_v5, 0 }
 0x494   :  { %2496 = vmatpush3.bf16.msra.mxu0 %v1506_v8 }
 0x495   :  { %1325 = vrot.lane.b32.xlu1 %v1320_v10, %s2728_s14  ;;  %v1569_v10 = vsel %vm52_vm0, %v2591_v6, 0  ;;  %2509 = vmatprep.subr.bf16.mxu0 %v2723_v13 }
 0x496   :  { %v1314_v41 = vpop.permute.xlu0 %1313 }
 0x497   :  { %v1319_v44 = vmul.f32 %v2611_v11, %v1314_v41 }
 0x499   :  { %1323 = vrot.lane.b32.xlu1 %v1319_v44, %s2728_s14 }
 0x507   :  { %v1326_v30 = vpop.permute.xlu1 %1325 }
 0x508   :  { %v1330_v28 = vadd.f32 %v1326_v30, %v1310_v9 }
 0x50a   :  { %2612 = vtanh.f32 %v1330_v28  ;;  %v1427_v46 = vrot.slane %v1330_v28, 7 }
 0x50b   :  { %v1324_v14 = vpop.permute.xlu1 %1323 }
 0x50c   :  { %v1329_v15 = vadd.f32 %v1324_v14, %v1309_v40 }
 0x50e   :  { %2614 = vtanh.f32 %v1329_v15 }
 0x514   :  { %v2613_v17 = vpop.eup %2612 }
 0x515   :  { %1337 = vrot.lane.b32.xlu0 %v2613_v17, %s2728_s14 }
 0x518   :  { %v2615_v18 = vpop.eup %2614 }
 0x519   :  { %1335 = vrot.lane.b32.xlu1 %v2615_v18, %s2728_s14 }
 0x587   :  { %v1338_v19 = vpop.permute.xlu0 %1337 }
 0x588   :  { %v3016_v21 = vmul.f32 %v2609_v32, %v1338_v19 }
 0x58a   :  { %v1344_v23 = vpack.c.bf16 %v3016_v21, %v3016_v21 }
 0x58b   :  { %v1336_v16 = vpop.permute.xlu1 %1335 }
 0x58c   :  { %v1348_v25 = vunpack.c.l.b16 %v1344_v23  ;;  %v3020_v27 = vmul.f32 %v2611_v11, %v1336_v16  ;;  %v2307_v16 = vld [vmem:[%s3171_s2 + $0x4] ss:$0 sm:$0xff] }
 0x58e   :  { %v1343_v31 = vpack.c.bf16 %v3020_v27, %v3020_v27  ;;  %v1349_v33 = vrot.slane %v1348_v25, 7 }
 0x590   :  { %v1347_v26 = vunpack.c.l.b16 %v1343_v31 }
 0x592   :  { %v1350_v34 = vsel %vm523_vm10, %v1349_v33, %v1347_v26 }
 0x593   :  { %v1351_v36 = vpack.c.b16 %v1350_v34, %v1350_v34 }
 0x595   :  { %1352 = vrot.lane.b32.xlu0 %v1351_v36, %s2729_s15 }
 0x607   :  { %v1353_v38 = vpop.permute.xlu0 %1352 }
 0x608   :  { %2490 = vmatmul.mubr.msk.bf16.vlgmr.msra.gmra.mrb[20].mxu1 %vm1235_vm11, %v1353_v38 }
 0x609   :  { %2505 = vmatprep.mubr.msk.bf16.mxu1 %vm2724_vm2, %v2723_v13  ;;  %2502 = vmatpush3.bf16.msra.mxu1 %v2589_v4 }
 0x60a   :  { %2503 = vmatprep.subr.bf16.mxu1 %v2723_v13 }
 0x60d   :  { %2504 = vmatpush3.bf16.msra.mxu1 %v1569_v10 }
 0x60e   :  { %2517 = vmatprep.subr.bf16.mxu1 %v2723_v13 }
 0x610   :  { %2506 = vmatmul.mubr.bf16.vlgmr.msra.gmra.mrb[24].mxu1 %v2726_v47 }
 0x611   :  { %2521 = vmatprep.mubr.msk.bf16.mxu1 %vm2724_vm2, %v2723_v13 }
 0x6db   :  { %v1391_v39 = vpop.f32.mrb[20].mxu1 }
 0x6dc   :  { %v1404_v42 = vrot.slane %v1391_v39, %v2829_v7  ;;  %v2491_v45 = vpop.f32.mrb[21].mxu1 }
 0x6dd   :  { %v1394_v48 = vpop.f32.mrb[22].mxu1 }
 0x6de   :  { %v1405_v22 = vrot.slane %v1404_v42, 7  ;;  %v1409_v49 = vadd.f32 %v1404_v42, %v3006_v0  ;;  %v2492_v50 = vpop.f32.mrb[23].mxu1  ;;  %v1426_v0 = vrot.slane %v1329_v15, 7 }
 0x6e0   :  { %v1408_v51 = vadd.f32 %v1405_v22, %v3002_v20  ;;  %2616 = vtanh.f32 %v1409_v49  ;;  %v2306_v53 = vmul.f32 -1.442695, %v1409_v49 }
 0x6e2   :  { %2618 = vtanh.f32 %v1408_v51  ;;  %v2305_v54 = vmul.f32 -1.442695, %v1408_v51 }
 0x6e3   :  { %2620 = vpow2.f32 %v2306_v53  ;;  %v1605_v18 = vpop.f32.mrb[24].mxu1 }
 0x6e4   :  { %2622 = vpow2.f32 %v2305_v54  ;;  %v2507_v19 = vpop.f32.mrb[25].mxu1  ;;  %v1618_v25 = vrot.slane %v1605_v18, %v2829_v7 }
 0x6e6   :  { %v1619_v36 = vrot.slane %v1618_v25, 1 }
 0x6ea   :  { %v2617_v37 = vpop.eup %2616 }
 0x6eb   :  { %1436 = vrot.lane.b32.xlu0 %v2617_v37, %s2727_s13 }
 0x6ec   :  { %v2619_v52 = vpop.eup %2618 }
 0x6ed   :  { %1434 = vrot.lane.b32.xlu1 %v2619_v52, %s2727_s13  ;;  %v2621_v55 = vpop.eup %2620 }
 0x6ee   :  { %v2623_v56 = vpop.eup %2622  ;;  %v1417_v57 = vadd.f32 1.0, %v2621_v55 }
 0x6ef   :  { %v1416_v58 = vadd.f32 1.0, %v2623_v56 }
 0x6f0   :  { %2624 = vrcp.f32 %v1417_v57 }
 0x6f1   :  { %2626 = vrcp.f32 %v1416_v58 }
 0x6fa   :  { %v2625_v59 = vpop.eup %2624 }
 0x6fb   :  { %v2627_v61 = vpop.eup %2626  ;;  %v1431_v63 = vmul.f32 %v2625_v59, %v1427_v46 }
 0x6fc   :  { %v1430_v3 = vmul.f32 %v2627_v61, %v1426_v0 }
 0x75d   :  { %v1437_v43 = vpop.permute.xlu0 %1436 }
 0x75e   :  { %v1441_v60 = vmul.f32 %v2625_v59, %v1437_v43 }
 0x75f   :  { %v1435_v62 = vpop.permute.xlu1 %1434 }
 0x760   :  { %1446 = vrot.lane.b32.xlu0 %v1441_v60, %s2728_s14  ;;  %v1440_v20 = vmul.f32 %v2627_v61, %v1435_v62 }
 0x762   :  { %1444 = vrot.lane.b32.xlu1 %v1440_v20, %s2728_s14 }
 0x7d2   :  { %v1447_v1 = vpop.permute.xlu0 %1446 }
 0x7d3   :  { %v1451_v2 = vadd.f32 %v1447_v1, %v1431_v63 }
 0x7d4   :  { %v1445_v12 = vpop.permute.xlu1 %1444 }
 0x7d5   :  { %2628 = vtanh.f32 %v1451_v2  ;;  %v1450_v24 = vadd.f32 %v1445_v12, %v1430_v3 }
 0x7d7   :  { %2630 = vtanh.f32 %v1450_v24 }
 0x7df   :  { %v2629_v29 = vpop.eup %2628 }
 0x7e0   :  { %1458 = vrot.lane.b32.xlu0 %v2629_v29, %s2728_s14 }
 0x7e1   :  { %v2631_v32 = vpop.eup %2630 }
 0x7e2   :  { %1456 = vrot.lane.b32.xlu1 %v2631_v32, %s2728_s14 }
 0x852   :  { %v1459_v11 = vpop.permute.xlu0 %1458 }
 0x853   :  { %v1463_v41 = vmul.f32 %v2625_v59, %v1459_v11 }
 0x854   :  { %v1457_v44 = vpop.permute.xlu1 %1456 }
 0x855   :  { %v1462_v9 = vmul.f32 %v2627_v61, %v1457_v44  ;;  %v1466_v30 = vsel %vm1464_vm12, %v3016_v21, %v1463_v41  ;;  %v1608_v21 = vpop.f32.mrb[26].mxu1 }
 0x856   :  { %v2508_v23 = vpop.f32.mrb[27].mxu1 }
 0x857   :  { %v1465_v28 = vsel %vm1464_vm12, %v3020_v27, %v1462_v9 }
 0x858   :  { %v1476_v40 = vcombine.low %v1465_v28, %v1466_v30 }
 0x85a   :  { %v1483_v14 = vrot.slane %v1476_v40, %v2829_v7 }
 0x85c   :  { %v1485_v15 = vpack.c.bf16 %v1483_v14, %v1483_v14 }
 0x85e   :  { %1491 = vrot.lane.b32.xlu1 %v1485_v15, %s2729_s15 }
 0x8d0   :  { %v1492_v17 = vpop.permute.xlu1 %1491 }
 0x8d1   :  { %2498 = vmatmul.mubr.msk.bf16.vlgmr.msra.gmra.mrb[24].mxu0 %vm1235_vm11, %v1492_v17 }
 0x8d2   :  { %2510 = vmatpush3.bf16.msra.mxu0 %v2589_v4  ;;  %2513 = vmatprep.mubr.msk.bf16.mxu0 %vm2724_vm2, %v2723_v13 }
 0x8d3   :  { %2511 = vmatprep.subr.bf16.mxu0 %v2723_v13 }
 0x8d6   :  { %2512 = vmatpush3.bf16.msra.mxu0 %v1569_v10 }
 0x8d7   :  { %2525 = vmatprep.subr.bf16.mxu0 %v2723_v13 }
 0x9a4   :  { %v1542_v27 = vpop.f32.mrb[24].mxu0 }
 0x9a5   :  { %v1543_v31 = vadd.f32 %v2307_v16, %v1542_v27  ;;  %v2499_v33 = vpop.f32.mrb[25].mxu0 }
 0x9a6   :  { %v1545_v26 = vpop.f32.mrb[26].mxu0 }
 0x9a7   :  { %v3063_v34 = vrot.slane %v1543_v31, %v2829_v7  ;;  %v2500_v38 = vpop.f32.mrb[27].mxu0 }
 0x9a9   :  { %v1556_v39 = vcombine.high %v3063_v34, %v3063_v34  ;;  %v1622_v42 = vadd.f32 %v1618_v25, %v3063_v34 }
 0x9ab   :  { %v1623_v45 = vadd.f32 %v1619_v36, %v1556_v39  ;;  %2632 = vtanh.f32 %v1622_v42  ;;  %v2313_v49 = vmul.f32 -1.442695, %v1622_v42 }
 0x9ad   :  { %2634 = vtanh.f32 %v1623_v45  ;;  %v2314_v50 = vmul.f32 -1.442695, %v1623_v45 }
 0x9ae   :  { %2636 = vpow2.f32 %v2313_v49 }
 0x9af   :  { %2638 = vpow2.f32 %v2314_v50 }
 0x9b5   :  { %v2633_v48 = vpop.eup %2632 }
 0x9b6   :  { %1642 = vrot.lane.b32.xlu1 %v2633_v48, %s2727_s13 }
 0x9b7   :  { %v2635_v22 = vpop.eup %2634 }
 0x9b8   :  { %1644 = vrot.lane.b32.xlu0 %v2635_v22, %s2727_s13  ;;  %v2637_v51 = vpop.eup %2636 }
 0x9b9   :  { %v2639_v37 = vpop.eup %2638  ;;  %v1630_v52 = vadd.f32 1.0, %v2637_v51  ;;  %v2592_v51 = vld [vmem:[#allocation2 + $0xb0] sm:$0xff]  }
 0x9ba   :  { %v1631_v53 = vadd.f32 1.0, %v2639_v37  ;;  %v2593_v37 = vld [vmem:[#allocation2 + $0xbc] sm:$0xff]   ;;  %2518 = vmatpush3.bf16.msra.mxu1 %v2592_v51 }
 0x9bb   :  { %2640 = vrcp.f32 %v1630_v52  ;;  %v2594_v52 = vld [vmem:[#allocation2 + $0xb8] ss:$0 sps:$4 sm:$0x33]   ;;  %2519 = vmatprep.subr.bf16.mxu1 %v2723_v13 }
 0x9bc   :  { %2642 = vrcp.f32 %v1631_v53  ;;  %v2595_v53 = vld [vmem:[#allocation2 + $0xc4] ss:$0 sps:$4 sm:$0x33]  }
 0x9c5   :  { %v2641_v54 = vpop.eup %2640 }
 0x9c6   :  { %v2643_v57 = vpop.eup %2642  ;;  %v1638_v43 = vmul.f32 0.0, %v2641_v54 }
 0x9c7   :  { %v1639_v62 = vmul.f32 0.0, %v2643_v57 }
 0xa28   :  { %v1643_v55 = vpop.permute.xlu1 %1642 }
 0xa29   :  { %v1648_v56 = vmul.f32 %v2641_v54, %v1643_v55  ;;  %v1834_v55 = vsel %vm52_vm0, %v2594_v52, 0 }
 0xa2a   :  { %v1645_v58 = vpop.permute.xlu0 %1644  ;;  %2520 = vmatpush3.bf16.msra.mxu1 %v1834_v55 }
 0xa2b   :  { %1652 = vrot.lane.b32.xlu1 %v1648_v56, %s2728_s14  ;;  %v1649_v59 = vmul.f32 %v2643_v57, %v1645_v58  ;;  %v1897_v56 = vsel %vm52_vm0, %v2595_v53, 0  ;;  %2533 = vmatprep.subr.bf16.mxu1 %v2723_v13 }
 0xa2d   :  { %1654 = vrot.lane.b32.xlu0 %v1649_v59, %s2728_s14 }
 0xa9d   :  { %v1653_v60 = vpop.permute.xlu1 %1652 }
 0xa9e   :  { %v3072_v61 = vadd.f32 %v1653_v60, %v1638_v43 }
 0xa9f   :  { %v1655_v20 = vpop.permute.xlu0 %1654 }
 0xaa0   :  { %2644 = vtanh.f32 %v3072_v61  ;;  %v1659_v46 = vadd.f32 %v1655_v20, %v1639_v62 }
 0xaa2   :  { %2646 = vtanh.f32 %v1659_v46  ;;  %v1756_v36 = vrot.slane %v1659_v46, 7 }
 0xaaa   :  { %v2645_v63 = vpop.eup %2644 }
 0xaab   :  { %1664 = vrot.lane.b32.xlu1 %v2645_v63, %s2728_s14 }
 0xaac   :  { %v2647_v0 = vpop.eup %2646 }
 0xaad   :  { %1666 = vrot.lane.b32.xlu0 %v2647_v0, %s2728_s14 }
 0xb1d   :  { %v1665_v1 = vpop.permute.xlu1 %1664 }
 0xb1e   :  { %v3077_v2 = vmul.f32 %v2641_v54, %v1665_v1 }
 0xb1f   :  { %v1667_v3 = vpop.permute.xlu0 %1666 }
 0xb20   :  { %v3079_v12 = vmul.f32 %v2643_v57, %v1667_v3  ;;  %v1672_v24 = vpack.c.bf16 %v3077_v2, %v3077_v2  ;;  %v2318_v3 = vld [vmem:[%s3171_s2 + $0x5] ss:$0 sm:$0xff] }
 0xb22   :  { %v1673_v29 = vpack.c.bf16 %v3079_v12, %v3079_v12  ;;  %v1676_v4 = vunpack.c.l.b16 %v1672_v24 }
 0xb24   :  { %v1677_v35 = vunpack.c.l.b16 %v1673_v29 }
 0xb26   :  { %v1678_v5 = vrot.slane %v1677_v35, 7 }
 0xb28   :  { %v1679_v6 = vsel %vm523_vm10, %v1678_v5, %v1676_v4 }
 0xb29   :  { %v1680_v32 = vpack.c.b16 %v1679_v6, %v1679_v6 }
 0xb2b   :  { %1681 = vrot.lane.b32.xlu0 %v1680_v32, %s2729_s15 }
 0xb9d   :  { %v1682_v8 = vpop.permute.xlu0 %1681 }
 0xb9e   :  { %2514 = vmatmul.mubr.msk.bf16.vlgmr.msra.gmra.mrb[28].mxu0 %vm1235_vm11, %v1682_v8 }
 0xb9f   :  { %2529 = vmatprep.mubr.msk.bf16.mxu0 %vm2724_vm2, %v2723_v13  ;;  %2526 = vmatpush3.bf16.msra.mxu0 %v2593_v37 }
 0xba0   :  { %2527 = vmatprep.subr.bf16.mxu0 %v2723_v13 }
 0xba3   :  { %2528 = vmatpush3.bf16.msra.mxu0 %v1897_v56 }
 0xba4   :  { %2541 = vmatprep.subr.bf16.mxu0 %v2723_v13 }
 0xba6   :  { %2530 = vmatmul.mubr.bf16.vlgmr.msra.gmra.mrb[32].mxu0 %v2726_v47 }
 0xba7   :  { %2545 = vmatprep.mubr.msk.bf16.mxu0 %vm2724_vm2, %v2723_v13 }
 0xc71   :  { %v1720_v10 = vpop.f32.mrb[28].mxu0 }
 0xc72   :  { %v1733_v11 = vrot.slane %v1720_v10, %v2829_v7  ;;  %v2515_v41 = vpop.f32.mrb[29].mxu0 }
 0xc73   :  { %v1723_v44 = vpop.f32.mrb[30].mxu0 }
 0xc74   :  { %v1734_v9 = vrot.slane %v1733_v11, 7  ;;  %v1738_v30 = vadd.f32 %v1733_v11, %v1556_v39  ;;  %v2516_v28 = vpop.f32.mrb[31].mxu0  ;;  %v1755_v39 = vrot.slane %v3072_v61, 7 }
 0xc76   :  { %v1737_v40 = vadd.f32 %v1734_v9, %v3063_v34  ;;  %2648 = vtanh.f32 %v1738_v30  ;;  %v2317_v17 = vmul.f32 -1.442695, %v1738_v30 }
 0xc78   :  { %2650 = vtanh.f32 %v1737_v40  ;;  %v2316_v18 = vmul.f32 -1.442695, %v1737_v40 }
 0xc79   :  { %2652 = vpow2.f32 %v2317_v17  ;;  %v1933_v63 = vpop.f32.mrb[32].mxu0 }
 0xc7a   :  { %2654 = vpow2.f32 %v2316_v18  ;;  %v2531_v0 = vpop.f32.mrb[33].mxu0 }
 0xc7b   :  { %v1936_v1 = vpop.f32.mrb[34].mxu0 }
 0xc80   :  { %v2649_v14 = vpop.eup %2648 }
 0xc81   :  { %1765 = vrot.lane.b32.xlu0 %v2649_v14, %s2727_s13 }
 0xc82   :  { %v2651_v15 = vpop.eup %2650 }
 0xc83   :  { %1763 = vrot.lane.b32.xlu1 %v2651_v15, %s2727_s13  ;;  %v2653_v19 = vpop.eup %2652 }
 0xc84   :  { %v2655_v21 = vpop.eup %2654  ;;  %v1746_v23 = vadd.f32 1.0, %v2653_v19 }
 0xc85   :  { %v1745_v16 = vadd.f32 1.0, %v2655_v21 }
 0xc86   :  { %2656 = vrcp.f32 %v1746_v23 }
 0xc87   :  { %2658 = vrcp.f32 %v1745_v16 }
 0xc90   :  { %v2657_v25 = vpop.eup %2656 }
 0xc91   :  { %v2659_v33 = vpop.eup %2658  ;;  %v1760_v38 = vmul.f32 %v2657_v25, %v1756_v36 }
 0xc92   :  { %v1759_v48 = vmul.f32 %v2659_v33, %v1755_v39 }
 0xcf3   :  { %v1766_v27 = vpop.permute.xlu0 %1765 }
 0xcf4   :  { %v1770_v31 = vmul.f32 %v2657_v25, %v1766_v27 }
 0xcf5   :  { %v1764_v26 = vpop.permute.xlu1 %1763 }
 0xcf6   :  { %1775 = vrot.lane.b32.xlu0 %v1770_v31, %s2728_s14  ;;  %v1769_v34 = vmul.f32 %v2659_v33, %v1764_v26 }
 0xcf8   :  { %1773 = vrot.lane.b32.xlu1 %v1769_v34, %s2728_s14 }
 0xd68   :  { %v1776_v42 = vpop.permute.xlu0 %1775 }
 0xd69   :  { %v1780_v45 = vadd.f32 %v1776_v42, %v1760_v38 }
 0xd6a   :  { %v1774_v22 = vpop.permute.xlu1 %1773 }
 0xd6b   :  { %2660 = vtanh.f32 %v1780_v45  ;;  %v1779_v49 = vadd.f32 %v1774_v22, %v1759_v48 }
 0xd6d   :  { %2662 = vtanh.f32 %v1779_v49 }
 0xd75   :  { %v2661_v50 = vpop.eup %2660 }
 0xd76   :  { %1787 = vrot.lane.b32.xlu0 %v2661_v50, %s2728_s14 }
 0xd77   :  { %v2663_v54 = vpop.eup %2662 }
 0xd78   :  { %1785 = vrot.lane.b32.xlu1 %v2663_v54, %s2728_s14 }
 0xde8   :  { %v1788_v57 = vpop.permute.xlu0 %1787 }
 0xde9   :  { %v1792_v58 = vmul.f32 %v2657_v25, %v1788_v57 }
 0xdea   :  { %v1786_v59 = vpop.permute.xlu1 %1785 }
 0xdeb   :  { %v1791_v43 = vmul.f32 %v2659_v33, %v1786_v59  ;;  %v1794_v60 = vsel %vm1464_vm12, %v3079_v12, %v1792_v58  ;;  %v1946_v12 = vrot.slane %v1933_v63, %v2829_v7 }
 0xded   :  { %v1793_v61 = vsel %vm1464_vm12, %v3077_v2, %v1791_v43  ;;  %v2532_v2 = vpop.f32.mrb[35].mxu0  ;;  %v1947_v6 = vrot.slane %v1946_v12, 1 }
 0xdee   :  { %v1804_v62 = vcombine.low %v1793_v61, %v1794_v60 }
 0xdf0   :  { %v1811_v20 = vrot.slane %v1804_v62, %v2829_v7 }
 0xdf2   :  { %v1813_v46 = vpack.c.bf16 %v1811_v20, %v1811_v20 }
 0xdf4   :  { %1819 = vrot.lane.b32.xlu1 %v1813_v46, %s2729_s15 }
 0xe66   :  { %v1820_v47 = vpop.permute.xlu1 %1819 }
 0xe67   :  { %2522 = vmatmul.mubr.msk.bf16.vlgmr.msra.gmra.mrb[28].mxu1 %vm1235_vm11, %v1820_v47 }
 0xe68   :  { %2534 = vmatpush3.bf16.msra.mxu1 %v2593_v37  ;;  %2537 = vmatprep.mubr.msk.bf16.mxu1 %vm2724_vm2, %v2723_v13 }
 0xe69   :  { %2535 = vmatprep.subr.bf16.mxu1 %v2723_v13 }
 0xe6c   :  { %2536 = vmatpush3.bf16.msra.mxu1 %v1897_v56 }
 0xe6d   :  { %2549 = vmatprep.subr.bf16.mxu1 %v2723_v13 }
 0xf3a   :  { %v1870_v24 = vpop.f32.mrb[28].mxu1 }
 0xf3b   :  { %v1871_v29 = vadd.f32 %v2318_v3, %v1870_v24  ;;  %v2523_v35 = vpop.f32.mrb[29].mxu1 }
 0xf3c   :  { %v1873_v4 = vpop.f32.mrb[30].mxu1 }
 0xf3d   :  { %v3124_v5 = vrot.slane %v1871_v29, %v2829_v7  ;;  %v2524_v32 = vpop.f32.mrb[31].mxu1 }
 0xf3f   :  { %v1884_v8 = vcombine.high %v3124_v5, %v3124_v5  ;;  %v1950_v10 = vadd.f32 %v1946_v12, %v3124_v5 }
 0xf41   :  { %v1951_v11 = vadd.f32 %v1947_v6, %v1884_v8  ;;  %2664 = vtanh.f32 %v1950_v10  ;;  %v2324_v9 = vmul.f32 -1.442695, %v1950_v10 }
 0xf43   :  { %2666 = vtanh.f32 %v1951_v11  ;;  %v2325_v30 = vmul.f32 -1.442695, %v1951_v11 }
 0xf44   :  { %2668 = vpow2.f32 %v2324_v9  ;;  %v2596_v9 = vld [vmem:[#allocation2 + $0xc8] sm:$0xff]  }
 0xf45   :  { %2670 = vpow2.f32 %v2325_v30  ;;  %v2597_v30 = vld [vmem:[#allocation2 + $0xd0] ss:$0 sps:$4 sm:$0x33]   ;;  %2542 = vmatpush3.bf16.msra.mxu0 %v2596_v9 }
 0xf46   :  { %2543 = vmatprep.subr.bf16.mxu0 %v2723_v13 }
 0xf4b   :  { %v2665_v41 = vpop.eup %2664 }
 0xf4c   :  { %1970 = vrot.lane.b32.xlu1 %v2665_v41, %s2727_s13 }
 0xf4d   :  { %v2667_v44 = vpop.eup %2666 }
 0xf4e   :  { %1972 = vrot.lane.b32.xlu0 %v2667_v44, %s2727_s13  ;;  %v2669_v28 = vpop.eup %2668 }
 0xf4f   :  { %v2671_v40 = vpop.eup %2670  ;;  %v1958_v14 = vadd.f32 1.0, %v2669_v28 }
 0xf50   :  { %v1959_v15 = vadd.f32 1.0, %v2671_v40  ;;  %v2157_v40 = vsel %vm52_vm0, %v2597_v30, 0 }
 0xf51   :  { %2672 = vrcp.f32 %v1958_v14  ;;  %2544 = vmatpush3.bf16.msra.mxu0 %v2157_v40 }
 0xf52   :  { %2674 = vrcp.f32 %v1959_v15 }
 0xf5b   :  { %v2673_v17 = vpop.eup %2672 }
 0xf5c   :  { %v2675_v21 = vpop.eup %2674  ;;  %v1966_v25 = vmul.f32 0.0, %v2673_v17 }
 0xf5d   :  { %v1967_v33 = vmul.f32 0.0, %v2675_v21 }
 0xfbe   :  { %v1971_v18 = vpop.permute.xlu1 %1970 }
 0xfbf   :  { %v1976_v19 = vmul.f32 %v2673_v17, %v1971_v18 }
 0xfc0   :  { %v1973_v23 = vpop.permute.xlu0 %1972 }
 0xfc1   :  { %1980 = vrot.lane.b32.xlu1 %v1976_v19, %s2728_s14  ;;  %v1977_v16 = vmul.f32 %v2675_v21, %v1973_v23 }
 0xfc3   :  { %1982 = vrot.lane.b32.xlu0 %v1977_v16, %s2728_s14 }
0x1033   :  { %v1981_v27 = vpop.permute.xlu1 %1980 }
0x1034   :  { %v3133_v31 = vadd.f32 %v1981_v27, %v1966_v25 }
0x1035   :  { %v1983_v26 = vpop.permute.xlu0 %1982 }
0x1036   :  { %2676 = vtanh.f32 %v3133_v31  ;;  %v1987_v34 = vadd.f32 %v1983_v26, %v1967_v33  ;;  %v2083_v6 = vrot.slane %v3133_v31, 7  ;;  %v2598_v26 = vld [vmem:[#allocation2 + $0xd4] sm:$0xff]  }
0x1038   :  { %2678 = vtanh.f32 %v1987_v34  ;;  %v2084_v4 = vrot.slane %v1987_v34, 7  ;;  %v2599_v34 = vld [vmem:[#allocation2 + $0xdc] ss:$0 sps:$4 sm:$0x33]  }
0x1040   :  { %v2677_v36 = vpop.eup %2676 }
0x1041   :  { %1992 = vrot.lane.b32.xlu1 %v2677_v36, %s2728_s14  ;;  %v2218_v36 = vsel %vm52_vm0, %v2599_v34, 0  ;;  %vm2260_vm0 = vcmask 1024  }
0x1042   :  { %v2679_v38 = vpop.eup %2678 }
0x1043   :  { %1994 = vrot.lane.b32.xlu0 %v2679_v38, %s2728_s14  ;;  %v2329_v38 = vld [vmem:[%s3171_s2 + $0x6] ss:$0 sm:$0xff] }
0x10b3   :  { %v1993_v39 = vpop.permute.xlu1 %1992 }
0x10b4   :  { %v1998_v42 = vmul.f32 %v2673_v17, %v1993_v39 }
0x10b5   :  { %v1995_v45 = vpop.permute.xlu0 %1994 }
0x10b6   :  { %v1999_v48 = vmul.f32 %v2675_v21, %v1995_v45  ;;  %v2000_v22 = vpack.c.bf16 %v1998_v42, %v1998_v42 }
0x10b8   :  { %v2001_v49 = vpack.c.bf16 %v1999_v48, %v1999_v48  ;;  %v2004_v51 = vunpack.c.l.b16 %v2000_v22 }
0x10ba   :  { %v2005_v50 = vunpack.c.l.b16 %v2001_v49 }
0x10bc   :  { %v2006_v37 = vrot.slane %v2005_v50, 7 }
0x10be   :  { %v2007_v52 = vsel %vm523_vm10, %v2006_v37, %v2004_v51 }
0x10bf   :  { %v2008_v53 = vpack.c.b16 %v2007_v52, %v2007_v52 }
0x10c1   :  { %2009 = vrot.lane.b32.xlu0 %v2008_v53, %s2729_s15 }
0x1133   :  { %v2010_v54 = vpop.permute.xlu0 %2009 }
0x1134   :  { %2538 = vmatmul.mubr.msk.bf16.vlgmr.msra.gmra.mrb[32].mxu1 %vm1235_vm11, %v2010_v54 }
0x1135   :  { %2553 = vmatprep.mubr.msk.bf16.mxu1 %vm2724_vm2, %v2723_v13  ;;  %2550 = vmatpush3.bf16.msra.mxu1 %v2598_v26 }
0x1136   :  { %2551 = vmatprep.subr.bf16.mxu1 %v2723_v13  ;;  %v2333_v13 = vld [vmem:[%s3171_s2 + $0x7] ss:$0 sm:$0xff] }
0x1139   :  { %2552 = vmatpush3.bf16.msra.mxu1 %v2218_v36 }
0x1207   :  { %v2048_v55 = vpop.f32.mrb[32].mxu1 }
0x1208   :  { %v2061_v56 = vrot.slane %v2048_v55, %v2829_v7  ;;  %v2539_v57 = vpop.f32.mrb[33].mxu1 }
0x1209   :  { %v2051_v58 = vpop.f32.mrb[34].mxu1 }
0x120a   :  { %v2062_v59 = vrot.slane %v2061_v56, 7  ;;  %v2066_v43 = vadd.f32 %v2061_v56, %v1884_v8  ;;  %v2540_v60 = vpop.f32.mrb[35].mxu1 }
0x120c   :  { %v2065_v61 = vadd.f32 %v2062_v59, %v3124_v5  ;;  %2680 = vtanh.f32 %v2066_v43  ;;  %v2328_v46 = vmul.f32 -1.442695, %v2066_v43 }
0x120e   :  { %2682 = vtanh.f32 %v2065_v61  ;;  %v2327_v47 = vmul.f32 -1.442695, %v2065_v61 }
0x120f   :  { %2684 = vpow2.f32 %v2328_v46 }
0x1210   :  { %2686 = vpow2.f32 %v2327_v47 }
0x1216   :  { %v2681_v62 = vpop.eup %2680 }
0x1217   :  { %2093 = vrot.lane.b32.xlu0 %v2681_v62, %s2727_s13 }
0x1218   :  { %v2683_v20 = vpop.eup %2682 }
0x1219   :  { %2091 = vrot.lane.b32.xlu1 %v2683_v20, %s2727_s13  ;;  %v2685_v7 = vpop.eup %2684 }
0x121a   :  { %v2687_v63 = vpop.eup %2686  ;;  %v2074_v0 = vadd.f32 1.0, %v2685_v7 }
0x121b   :  { %v2073_v1 = vadd.f32 1.0, %v2687_v63 }
0x121c   :  { %2688 = vrcp.f32 %v2074_v0 }
0x121d   :  { %2690 = vrcp.f32 %v2073_v1 }
0x1226   :  { %v2689_v2 = vpop.eup %2688 }
0x1227   :  { %v2691_v24 = vpop.eup %2690  ;;  %v2088_v5 = vmul.f32 %v2689_v2, %v2084_v4 }
0x1228   :  { %v2087_v10 = vmul.f32 %v2691_v24, %v2083_v6 }
0x1289   :  { %v2094_v3 = vpop.permute.xlu0 %2093 }
0x128a   :  { %v2098_v12 = vmul.f32 %v2689_v2, %v2094_v3 }
0x128b   :  { %v2092_v29 = vpop.permute.xlu1 %2091 }
0x128c   :  { %2103 = vrot.lane.b32.xlu0 %v2098_v12, %s2728_s14  ;;  %v2097_v35 = vmul.f32 %v2691_v24, %v2092_v29 }
0x128e   :  { %2101 = vrot.lane.b32.xlu1 %v2097_v35, %s2728_s14 }
0x12fe   :  { %v2104_v32 = vpop.permute.xlu0 %2103 }
0x12ff   :  { %v2108_v8 = vadd.f32 %v2104_v32, %v2088_v5 }
0x1300   :  { %v2102_v11 = vpop.permute.xlu1 %2101 }
0x1301   :  { %2692 = vtanh.f32 %v2108_v8  ;;  %v2107_v41 = vadd.f32 %v2102_v11, %v2087_v10 }
0x1303   :  { %2694 = vtanh.f32 %v2107_v41 }
0x130b   :  { %v2693_v44 = vpop.eup %2692 }
0x130c   :  { %2115 = vrot.lane.b32.xlu0 %v2693_v44, %s2728_s14 }
0x130d   :  { %v2695_v28 = vpop.eup %2694 }
0x130e   :  { %2113 = vrot.lane.b32.xlu1 %v2695_v28, %s2728_s14 }
0x137e   :  { %v2116_v14 = vpop.permute.xlu0 %2115 }
0x137f   :  { %v2120_v15 = vmul.f32 %v2689_v2, %v2116_v14 }
0x1380   :  { %v2114_v17 = vpop.permute.xlu1 %2113 }
0x1381   :  { %v2119_v18 = vmul.f32 %v2691_v24, %v2114_v17  ;;  %v2130_v19 = vpack.c.bf16 %v2120_v15, %v2120_v15 }
0x1383   :  { %v2129_v21 = vpack.c.bf16 %v2119_v18, %v2119_v18  ;;  %v2138_v16 = vunpack.c.l.b16 %v2130_v19 }
0x1385   :  { %v2137_v23 = vunpack.c.l.b16 %v2129_v21 }
0x1387   :  { %v2139_v25 = vrot.slane %v2137_v23, 1 }
0x1389   :  { %v2140_v27 = vsel %vm523_vm10, %v2138_v16, %v2139_v25 }
0x138a   :  { %v2141_v31 = vpack.c.b16 %v2140_v27, %v2140_v27 }
0x138c   :  { %2142 = vrot.lane.b32.xlu1 %v2141_v31, %s2729_s15 }
0x13fe   :  { %v2143_v33 = vpop.permute.xlu1 %2142 }
0x13ff   :  { %2546 = vmatmul.mubr.msk.bf16.vlgmr.msra.gmra.mrb[36].mxu0 %vm1235_vm11, %v2143_v33 }
0x14d2   :  { %v2193_v39 = vpop.f32.mrb[36].mxu0 }
0x14d3   :  { %v2194_v42 = vadd.f32 %v2329_v38, %v2193_v39  ;;  %v2547_v45 = vpop.f32.mrb[37].mxu0 }
0x14d4   :  { %v2196_v48 = vpop.f32.mrb[38].mxu0 }
0x14d5   :  { %v2199_v22 = vmax.f32 %v2194_v42, 0.0  ;;  %v2548_v49 = vpop.f32.mrb[39].mxu0 }
0x14d7   :  { %v2200_v50 = vpack.c.bf16 %v2199_v22, %v2199_v22 }
0x14d9   :  { %2554 = vmatmul.mubr.msk.bf16.vlgmr.msra.gmra.mrb[36].mxu1 %vm1235_vm11, %v2200_v50 }
0x15ac   :  { %v2254_v51 = vpop.f32.mrb[36].mxu1 }
0x15ad   :  { %v2255_v37 = vadd.f32 %v2333_v13, %v2254_v51  ;;  %v2555_v52 = vpop.f32.mrb[37].mxu1 }
0x15ae   :  { %v2257_v53 = vpop.f32.mrb[38].mxu1 }
0x15af   :  { %2261 = vst.msk [vmem:[%s3172_s3] sm:$0x3] %vm2260_vm0, %v2255_v37  ;;  %v2556_v54 = vpop.f32.mrb[39].mxu1 }
0x15b0   :  { %2266 = vsyncpa [#allocation3], 1 }

</bundles_post_ra>
